<compile_context>
chip_gen: v6e
topology: v6e:2x2x1
jax: 0.10.0
libtpu: 0.0.40
codegen_flags: <defaults>
</compile_context>

<pallas_src>
import math

import jax
import jax.numpy as jnp
from jax.experimental import pallas as pl
from jax.experimental.pallas import tpu as pltpu


_LANE = 128
_SQRT_2_OVER_PI = math.sqrt(2.0 / math.pi)
_INV_SQRT2 = 1.0 / math.sqrt(2.0)


def _round_up(x, m):
    return (x + m - 1) // m * m


def _gelu_tanh(x):
    # tanh-approx GELU: the tanh runs on the EUP slot, relieving the VALUs.
    x3 = x * x * x
    return 0.5 * x * (1.0 + jnp.tanh(_SQRT_2_OVER_PI * (x + 0.044715 * x3)))


def _gelu_exact(x):
    # exact erf GELU (torch.nn.GELU default) -- used only by the JAX reference.
    return 0.5 * x * (1.0 + jax.lax.erf(x * _INV_SQRT2))


def _make_kernel(R, taps):
    # taps: list of (tap_index_in_wd, flat_row_offset) for the 8 off-center taps,
    # in the same order as the precomputed mask columns.
    def kernel(x_ref, mask_ref, w1_ref, b1_ref, s1_ref, t1_ref,
               wd_ref, bd_ref, w2_ref, t3_ref, o_ref):
        # ---- conv1 (1x1): bf16 MXU operands, f32 accumulate, +bias,
        #      tanh GELU, folded BN1 scale/shift.
        x = x_ref[...].astype(w1_ref.dtype)
        z = jnp.dot(x, w1_ref[...], preferred_element_type=jnp.float32)
        y = _gelu_tanh(z + b1_ref[...]) * s1_ref[...] + t1_ref[...]   # (R, Ch_p)

        # ---- depthwise 3x3 (stride 1, pad 1) + residual (folded into the
        #      center-tap weight), register-resident via XLU rolls and
        #      host-precomputed 0/1 boundary masks.
        wd = wd_ref[...]                                              # (9, Ch_p)
        msk = mask_ref[...]                                           # (R, 8)
        acc = y * wd[4:5, :] + bd_ref[...]        # center tap (w+1) + bias
        for col, (tap, off) in enumerate(taps):
            shifted = pltpu.roll(y, shift=(-off) % R, axis=0)
            acc = acc + (shifted * msk[:, col:col + 1]) * wd[tap:tap + 1, :]
        # TODO(synk): on v6e/v7x run this stencil in packed bf16 (2x VALU) once
        # validated against the accuracy budget.

        # BN2 is folded into w2 on the host, so conv2 consumes gelu(acc) directly.
        r = _gelu_tanh(acc)

        # ---- conv2 (1x1): w2'' = diag(s2)·w2·diag(s3); all additive terms
        #      (t2@w2·s3 + b2*s3 + t3) folded into one row.
        out = jnp.dot(r.astype(w2_ref.dtype), w2_ref[...],
                      preferred_element_type=jnp.float32)
        o_ref[...] = (out + t3_ref[...]).astype(o_ref.dtype)

    return kernel


def _pick_images_per_step(B, N, rows_target):
    """Images per grid step: fill ~rows_target rows, keep >=2 grid steps if possible."""
    divs = [d for d in range(1, B + 1) if B % d == 0]
    # Keep at least 2 grid steps when B allows so the "parallel" batch axis can
    # shard across v7x's two TensorCores.
    cands = [d for d in divs if B // d >= 2] or divs
    fits = [d for d in cands if d * N <= rows_target]
    d = max(fits) if fits else min(cands)
    if (d * N) % 8 != 0:
        legal = [c for c in cands if (c * N) % 8 == 0]
        lfits = [c for c in legal if c * N <= rows_target]
        d = max(lfits) if lfits else (min(legal) if legal else B)
    return d


def conv_mlp_pallas(x, params, H, W, *, matmul_dtype=jnp.bfloat16,
                    rows_target=2048):
    B, N, Cin = x.shape
    assert N == H * W
    Ch = params["w1"].shape[1]
    Co = params["w2"].shape[1]

    Ch_p = _round_up(Ch, _LANE)
    Co_p = _round_up(Co, _LANE)
    # Lane-dense output stores are only worth the padded writeback + slice pass
    # when the inflation is small; otherwise store the true Co (masked vst).
    Cout = Co_p if Co_p <= 2 * Co else Co

    f32 = jnp.float32

    # ---------------- host-side parameter folding / padding (once) ----------
    w1 = jnp.zeros((Cin, Ch_p), f32).at[:, :Ch].set(params["w1"].astype(f32))
    b1 = jnp.zeros((1, Ch_p), f32).at[:, :Ch].set(params["b1"].astype(f32))
    s1 = jnp.zeros((1, Ch_p), f32).at[:, :Ch].set(params["s1"])
    t1 = jnp.zeros((1, Ch_p), f32).at[:, :Ch].set(params["t1"])

    wd_c = params["wd"].astype(f32).at[4].add(1.0)      # residual -> center tap
    wd = jnp.zeros((9, Ch_p), f32).at[:, :Ch].set(wd_c)
    bd = jnp.zeros((1, Ch_p), f32).at[:, :Ch].set(params["bd"])

    # Fold BN2 + conv2 bias + BN3 into one matmul + one additive row:
    #   out = (gelu(acc)*s2 + t2) @ w2 * s3 + b2*s3 + t3
    #       = gelu(acc) @ (s2^T * w2 * s3) + (t2 @ (w2*s3) + b2*s3 + t3)
    w2s3 = params["w2"].astype(f32) * params["s3"].astype(f32)          # (Ch, Co)
    w2f = params["s2"].astype(f32).reshape(Ch, 1) * w2s3                # (Ch, Co)
    t3f = (params["t2"].astype(f32) @ w2s3
           + params["b2"].astype(f32) * params["s3"].astype(f32)
           + params["t3"].astype(f32))                                  # (1, Co)
    w2 = jnp.zeros((Ch_p, Cout), f32).at[:Ch, :Co].set(w2f)
    t3 = jnp.zeros((1, Cout), f32).at[:, :Co].set(t3f)

    # bf16 MXU operands (f32 accumulation inside the kernel).
    w1 = w1.astype(matmul_dtype)
    w2 = w2.astype(matmul_dtype)

    # ---------------- rows-per-step / grid selection -------------------------
    Bt = _pick_images_per_step(B, N, rows_target)
    R = Bt * N
    grid = (B // Bt,)
    # TODO(synk): for very large feature maps (N >~ 2k) on v7x (64 MiB VMEM),
    # add intra-image row tiling with a W-row halo instead of R = N per step.

    # ------------- host-precomputed 3x3 boundary masks (same every block) ---
    flat = jnp.arange(R)
    hh = (flat % N) // W
    ww = flat % W
    taps = []
    cols = []
    for dh in range(3):
        for dw in range(3):
            if dh == 1 and dw == 1:
                continue
            rh, rw = dh - 1, dw - 1
            taps.append((dh * 3 + dw, rh * W + rw))
            ok = jnp.logical_and(
                jnp.logical_and(hh + rh >= 0, hh + rh < H),
                jnp.logical_and(ww + rw >= 0, ww + rw < W))
            cols.append(ok)
    masks = jnp.stack(cols, axis=1).astype(f32)                      # (R, 8)

    # ---------------- flattened, UNPADDED activations -----------------------
    rows_total = B * N
    x2 = x.reshape(rows_total, Cin)          # no host-side padding / extra copy

    param_vals = [masks, w1, b1, s1, t1, wd, bd, w2, t3]

    def const_spec(a):
        # Grid-invariant parameters; fetched once (constant block index).
        # TODO(synk): pipeline_mode=pl.Buffered(1) would halve their VMEM
        # footprint on v7x; negligible at these parameter sizes.
        return pl.BlockSpec(a.shape, lambda b: (0, 0))

    in_specs = ([pl.BlockSpec((R, Cin), lambda b: (b, 0))]
                + [const_spec(p) for p in param_vals])

    cost = pl.CostEstimate(
        flops=int(2 * rows_total * (Cin * Ch_p + Ch_p * Cout)
                  + 30 * rows_total * Ch_p),
        transcendentals=int(2 * rows_total * Ch_p),
        bytes_accessed=int(x2.size * x2.dtype.itemsize
                           + rows_total * Cout * jnp.dtype(x.dtype).itemsize
                           + sum(int(p.size) * p.dtype.itemsize
                                 for p in param_vals)),
    )

    try:
        vmem_cap = int(pltpu.get_tpu_info().vmem_capacity_bytes)
    except Exception:
        vmem_cap = 128 * 1024 * 1024
    vmem_limit = min(96 * 1024 * 1024, vmem_cap * 3 // 4)

    out = pl.pallas_call(
        _make_kernel(R, taps),
        out_shape=jax.ShapeDtypeStruct((rows_total, Cout), x.dtype),
        grid=grid,
        in_specs=in_specs,
        out_specs=pl.BlockSpec((R, Cout), lambda b: (b, 0)),
        compiler_params=pltpu.CompilerParams(
            dimension_semantics=("parallel",),
            vmem_limit_bytes=vmem_limit,
        ),
        cost_estimate=cost,
    )(x2, *param_vals)

    if Cout != Co:
        out = out[:, :Co]
    return out.reshape(B, N, Co)


def init_params(key, Cin, Ch, Co):
    ks = jax.random.split(key, 18)

    def bn_fold(kg, kb, km, kv, C):
        eps = 1e-5
        gamma = 0.8 + 0.4 * jax.random.uniform(kg, (1, C), jnp.float32)
        beta = 0.1 * jax.random.normal(kb, (1, C), jnp.float32)
        rmean = 0.1 * jax.random.normal(km, (1, C), jnp.float32)
        rvar = 0.5 + jax.random.uniform(kv, (1, C), jnp.float32)
        s = gamma / jnp.sqrt(rvar + eps)
        t = beta - rmean * s
        return s, t

    p = {}
    p["w1"] = 0.1 * jax.random.normal(ks[0], (Cin, Ch), jnp.float32)
    p["b1"] = 0.1 * jax.random.normal(ks[1], (1, Ch), jnp.float32)
    p["s1"], p["t1"] = bn_fold(ks[2], ks[3], ks[4], ks[5], Ch)
    # depthwise 3x3 weights stored as (9, Ch)  (PyTorch shape (Ch, 1, 3, 3))
    p["wd"] = 0.2 * jax.random.normal(ks[6], (9, Ch), jnp.float32)
    p["bd"] = 0.1 * jax.random.normal(ks[7], (1, Ch), jnp.float32)
    p["s2"], p["t2"] = bn_fold(ks[8], ks[9], ks[10], ks[11], Ch)
    p["w2"] = 0.1 * jax.random.normal(ks[12], (Ch, Co), jnp.float32)
    p["b2"] = 0.1 * jax.random.normal(ks[13], (1, Co), jnp.float32)
    p["s3"], p["t3"] = bn_fold(ks[14], ks[15], ks[16], ks[17], Co)
    return p


def conv_mlp_ref(x, p, H, W):
    # pure-JAX reference of the eval-mode forward pass (exact erf GELU,
    # unfused/unfolded), mirroring the PyTorch module.
    B, N, Cin = x.shape
    Ch = p["w1"].shape[1]
    y = _gelu_exact(x @ p["w1"] + p["b1"])
    y = y * p["s1"] + p["t1"]
    y3 = y.reshape(B, H, W, Ch)
    ypad = jnp.pad(y3, ((0, 0), (1, 1), (1, 1), (0, 0)))
    acc = jnp.zeros_like(y3) + p["bd"].reshape(1, 1, 1, Ch)
    for dh in range(3):
        for dw in range(3):
            acc = acc + ypad[:, dh:dh + H, dw:dw + W, :] * \
                p["wd"][dh * 3 + dw].reshape(1, 1, 1, Ch)
    r = _gelu_exact(acc + y3)
    r = r * p["s2"].reshape(1, 1, 1, Ch) + p["t2"].reshape(1, 1, 1, Ch)
    out = r.reshape(B, N, Ch) @ p["w2"] + p["b2"]
    out = out * p["s3"] + p["t3"]
    return out


if __name__ == "__main__":
    B, Cin, Ch, Co = 2, 16, 32, 16
    H = W = 8
    N = H * W

    key = jax.random.PRNGKey(0)
    kx, kp = jax.random.split(key)
    x = jax.random.normal(kx, (B, N, Cin), jnp.float32)
    params = init_params(kp, Cin, Ch, Co)

    out = conv_mlp_pallas(x, params, H, W)
    out = jax.block_until_ready(out)

    ref = conv_mlp_ref(x, params, H, W)
    assert out.shape == (B, N, Co)
    max_err = float(jnp.max(jnp.abs(out - ref)))
    assert jnp.allclose(out, ref, rtol=2e-2, atol=2e-2), max_err

    print("KERNEL_OK")
</pallas_src>

<mosaic_0001>
module attributes {stable_mosaic.version = 11 : i64} {
  func.func @kernel(%arg0: i32, %arg1: memref<64x16xf32, #tpu.memory_space<vmem>>, %arg2: memref<64x8xf32, #tpu.memory_space<vmem>>, %arg3: memref<16x128xbf16, #tpu.memory_space<vmem>>, %arg4: memref<1x128xf32, #tpu.memory_space<vmem>>, %arg5: memref<1x128xf32, #tpu.memory_space<vmem>>, %arg6: memref<1x128xf32, #tpu.memory_space<vmem>>, %arg7: memref<9x128xf32, #tpu.memory_space<vmem>>, %arg8: memref<1x128xf32, #tpu.memory_space<vmem>>, %arg9: memref<128x16xbf16, #tpu.memory_space<vmem>>, %arg10: memref<1x16xf32, #tpu.memory_space<vmem>>, %arg11: memref<64x16xf32, #tpu.memory_space<vmem>>) attributes {dimension_semantics = [#tpu.dimension_semantics<parallel>], iteration_bounds = array<i64: 2>, scalar_prefetch = 0 : i64, scratch_operands = 0 : i64, tpu.core_type = #tpu.core_type<tc>, window_params = [{transform_indices = @transform_0, window_bounds = array<i64: 64, 16>}, {pipeline_mode = #tpu.pipeline_mode<synchronous>, transform_indices = @transform_1, window_bounds = array<i64: 64, 8>}, {pipeline_mode = #tpu.pipeline_mode<synchronous>, transform_indices = @transform_2, window_bounds = array<i64: 16, 128>}, {pipeline_mode = #tpu.pipeline_mode<synchronous>, transform_indices = @transform_3, window_bounds = array<i64: 1, 128>}, {pipeline_mode = #tpu.pipeline_mode<synchronous>, transform_indices = @transform_4, window_bounds = array<i64: 1, 128>}, {pipeline_mode = #tpu.pipeline_mode<synchronous>, transform_indices = @transform_5, window_bounds = array<i64: 1, 128>}, {pipeline_mode = #tpu.pipeline_mode<synchronous>, transform_indices = @transform_6, window_bounds = array<i64: 9, 128>}, {pipeline_mode = #tpu.pipeline_mode<synchronous>, transform_indices = @transform_7, window_bounds = array<i64: 1, 128>}, {pipeline_mode = #tpu.pipeline_mode<synchronous>, transform_indices = @transform_8, window_bounds = array<i64: 128, 16>}, {pipeline_mode = #tpu.pipeline_mode<synchronous>, transform_indices = @transform_9, window_bounds = array<i64: 1, 16>}, {transform_indices = @transform_10, window_bounds = array<i64: 64, 16>}]} {
    %c0 = arith.constant 0 : index
    %c0_0 = arith.constant 0 : index
    %0 = vector.load %arg1[%c0, %c0_0] : memref<64x16xf32, #tpu.memory_space<vmem>>, vector<64x16xf32>
    %1 = arith.truncf %0 : vector<64x16xf32> to vector<64x16xbf16>
    %c0_1 = arith.constant 0 : index
    %c0_2 = arith.constant 0 : index
    %2 = vector.load %arg3[%c0_1, %c0_2] : memref<16x128xbf16, #tpu.memory_space<vmem>>, vector<16x128xbf16>
    %cst = arith.constant dense<0.000000e+00> : vector<64x128xf32>
    %3 = tpu.matmul %1, %2, %cst {dimension_numbers = #tpu.dot_dimension_numbers<[1], [0], [0], [1], [0, 0, 1, 1], [], []>} : vector<64x16xbf16>, vector<16x128xbf16>, vector<64x128xf32> -> vector<64x128xf32>
    %c0_3 = arith.constant 0 : index
    %c0_4 = arith.constant 0 : index
    %4 = vector.load %arg4[%c0_3, %c0_4] : memref<1x128xf32, #tpu.memory_space<vmem>>, vector<1x128xf32>
    %5 = vector.broadcast %4 : vector<1x128xf32> to vector<64x128xf32>
    %6 = arith.addf %3, %5 : vector<64x128xf32>
    %7 = arith.mulf %6, %6 : vector<64x128xf32>
    %8 = arith.mulf %7, %6 : vector<64x128xf32>
    %cst_5 = arith.constant 5.000000e-01 : f32
    %9 = vector.broadcast %cst_5 : f32 to vector<64x128xf32>
    %10 = arith.mulf %9, %6 : vector<64x128xf32>
    %cst_6 = arith.constant 4.471500e-02 : f32
    %11 = vector.broadcast %cst_6 : f32 to vector<64x128xf32>
    %12 = arith.mulf %11, %8 : vector<64x128xf32>
    %13 = arith.addf %6, %12 : vector<64x128xf32>
    %cst_7 = arith.constant 0.797884583 : f32
    %14 = vector.broadcast %cst_7 : f32 to vector<64x128xf32>
    %15 = arith.mulf %14, %13 : vector<64x128xf32>
    %16 = math.tanh %15 : vector<64x128xf32>
    %cst_8 = arith.constant 1.000000e+00 : f32
    %17 = vector.broadcast %cst_8 : f32 to vector<64x128xf32>
    %18 = arith.addf %17, %16 : vector<64x128xf32>
    %19 = arith.mulf %10, %18 : vector<64x128xf32>
    %c0_9 = arith.constant 0 : index
    %c0_10 = arith.constant 0 : index
    %20 = vector.load %arg5[%c0_9, %c0_10] : memref<1x128xf32, #tpu.memory_space<vmem>>, vector<1x128xf32>
    %21 = vector.broadcast %20 : vector<1x128xf32> to vector<64x128xf32>
    %22 = arith.mulf %19, %21 : vector<64x128xf32>
    %c0_11 = arith.constant 0 : index
    %c0_12 = arith.constant 0 : index
    %23 = vector.load %arg6[%c0_11, %c0_12] : memref<1x128xf32, #tpu.memory_space<vmem>>, vector<1x128xf32>
    %24 = vector.broadcast %23 : vector<1x128xf32> to vector<64x128xf32>
    %25 = arith.addf %22, %24 : vector<64x128xf32>
    %c0_13 = arith.constant 0 : index
    %c0_14 = arith.constant 0 : index
    %26 = vector.load %arg7[%c0_13, %c0_14] : memref<9x128xf32, #tpu.memory_space<vmem>>, vector<9x128xf32>
    %c0_15 = arith.constant 0 : index
    %c0_16 = arith.constant 0 : index
    %27 = vector.load %arg2[%c0_15, %c0_16] : memref<64x8xf32, #tpu.memory_space<vmem>>, vector<64x8xf32>
    %28 = vector.extract_strided_slice %26 {offsets = [4, 0], sizes = [1, 128], strides = [1, 1]} : vector<9x128xf32> to vector<1x128xf32>
    %29 = vector.broadcast %28 : vector<1x128xf32> to vector<64x128xf32>
    %30 = arith.mulf %25, %29 : vector<64x128xf32>
    %c0_17 = arith.constant 0 : index
    %c0_18 = arith.constant 0 : index
    %31 = vector.load %arg8[%c0_17, %c0_18] : memref<1x128xf32, #tpu.memory_space<vmem>>, vector<1x128xf32>
    %32 = vector.broadcast %31 : vector<1x128xf32> to vector<64x128xf32>
    %33 = arith.addf %30, %32 : vector<64x128xf32>
    %c9_i32 = arith.constant 9 : i32
    %34 = tpu.dynamic_rotate %25 by %c9_i32 dim 0 : vector<64x128xf32>, i32 -> vector<64x128xf32>
    %35 = vector.extract_strided_slice %27 {offsets = [0, 0], sizes = [64, 1], strides = [1, 1]} : vector<64x8xf32> to vector<64x1xf32>
    %36 = vector.broadcast %35 : vector<64x1xf32> to vector<64x128xf32>
    %37 = arith.mulf %34, %36 : vector<64x128xf32>
    %38 = vector.extract_strided_slice %26 {offsets = [0, 0], sizes = [1, 128], strides = [1, 1]} : vector<9x128xf32> to vector<1x128xf32>
    %39 = vector.broadcast %38 : vector<1x128xf32> to vector<64x128xf32>
    %40 = arith.mulf %37, %39 : vector<64x128xf32>
    %41 = arith.addf %33, %40 : vector<64x128xf32>
    %c8_i32 = arith.constant 8 : i32
    %42 = tpu.dynamic_rotate %25 by %c8_i32 dim 0 : vector<64x128xf32>, i32 -> vector<64x128xf32>
    %43 = vector.extract_strided_slice %27 {offsets = [0, 1], sizes = [64, 1], strides = [1, 1]} : vector<64x8xf32> to vector<64x1xf32>
    %44 = vector.broadcast %43 : vector<64x1xf32> to vector<64x128xf32>
    %45 = arith.mulf %42, %44 : vector<64x128xf32>
    %46 = vector.extract_strided_slice %26 {offsets = [1, 0], sizes = [1, 128], strides = [1, 1]} : vector<9x128xf32> to vector<1x128xf32>
    %47 = vector.broadcast %46 : vector<1x128xf32> to vector<64x128xf32>
    %48 = arith.mulf %45, %47 : vector<64x128xf32>
    %49 = arith.addf %41, %48 : vector<64x128xf32>
    %c7_i32 = arith.constant 7 : i32
    %50 = tpu.dynamic_rotate %25 by %c7_i32 dim 0 : vector<64x128xf32>, i32 -> vector<64x128xf32>
    %51 = vector.extract_strided_slice %27 {offsets = [0, 2], sizes = [64, 1], strides = [1, 1]} : vector<64x8xf32> to vector<64x1xf32>
    %52 = vector.broadcast %51 : vector<64x1xf32> to vector<64x128xf32>
    %53 = arith.mulf %50, %52 : vector<64x128xf32>
    %54 = vector.extract_strided_slice %26 {offsets = [2, 0], sizes = [1, 128], strides = [1, 1]} : vector<9x128xf32> to vector<1x128xf32>
    %55 = vector.broadcast %54 : vector<1x128xf32> to vector<64x128xf32>
    %56 = arith.mulf %53, %55 : vector<64x128xf32>
    %57 = arith.addf %49, %56 : vector<64x128xf32>
    %c1_i32 = arith.constant 1 : i32
    %58 = tpu.dynamic_rotate %25 by %c1_i32 dim 0 : vector<64x128xf32>, i32 -> vector<64x128xf32>
    %59 = vector.extract_strided_slice %27 {offsets = [0, 3], sizes = [64, 1], strides = [1, 1]} : vector<64x8xf32> to vector<64x1xf32>
    %60 = vector.broadcast %59 : vector<64x1xf32> to vector<64x128xf32>
    %61 = arith.mulf %58, %60 : vector<64x128xf32>
    %62 = vector.extract_strided_slice %26 {offsets = [3, 0], sizes = [1, 128], strides = [1, 1]} : vector<9x128xf32> to vector<1x128xf32>
    %63 = vector.broadcast %62 : vector<1x128xf32> to vector<64x128xf32>
    %64 = arith.mulf %61, %63 : vector<64x128xf32>
    %65 = arith.addf %57, %64 : vector<64x128xf32>
    %c63_i32 = arith.constant 63 : i32
    %66 = tpu.dynamic_rotate %25 by %c63_i32 dim 0 : vector<64x128xf32>, i32 -> vector<64x128xf32>
    %67 = vector.extract_strided_slice %27 {offsets = [0, 4], sizes = [64, 1], strides = [1, 1]} : vector<64x8xf32> to vector<64x1xf32>
    %68 = vector.broadcast %67 : vector<64x1xf32> to vector<64x128xf32>
    %69 = arith.mulf %66, %68 : vector<64x128xf32>
    %70 = vector.extract_strided_slice %26 {offsets = [5, 0], sizes = [1, 128], strides = [1, 1]} : vector<9x128xf32> to vector<1x128xf32>
    %71 = vector.broadcast %70 : vector<1x128xf32> to vector<64x128xf32>
    %72 = arith.mulf %69, %71 : vector<64x128xf32>
    %73 = arith.addf %65, %72 : vector<64x128xf32>
    %c57_i32 = arith.constant 57 : i32
    %74 = tpu.dynamic_rotate %25 by %c57_i32 dim 0 : vector<64x128xf32>, i32 -> vector<64x128xf32>
    %75 = vector.extract_strided_slice %27 {offsets = [0, 5], sizes = [64, 1], strides = [1, 1]} : vector<64x8xf32> to vector<64x1xf32>
    %76 = vector.broadcast %75 : vector<64x1xf32> to vector<64x128xf32>
    %77 = arith.mulf %74, %76 : vector<64x128xf32>
    %78 = vector.extract_strided_slice %26 {offsets = [6, 0], sizes = [1, 128], strides = [1, 1]} : vector<9x128xf32> to vector<1x128xf32>
    %79 = vector.broadcast %78 : vector<1x128xf32> to vector<64x128xf32>
    %80 = arith.mulf %77, %79 : vector<64x128xf32>
    %81 = arith.addf %73, %80 : vector<64x128xf32>
    %c56_i32 = arith.constant 56 : i32
    %82 = tpu.dynamic_rotate %25 by %c56_i32 dim 0 : vector<64x128xf32>, i32 -> vector<64x128xf32>
    %83 = vector.extract_strided_slice %27 {offsets = [0, 6], sizes = [64, 1], strides = [1, 1]} : vector<64x8xf32> to vector<64x1xf32>
    %84 = vector.broadcast %83 : vector<64x1xf32> to vector<64x128xf32>
    %85 = arith.mulf %82, %84 : vector<64x128xf32>
    %86 = vector.extract_strided_slice %26 {offsets = [7, 0], sizes = [1, 128], strides = [1, 1]} : vector<9x128xf32> to vector<1x128xf32>
    %87 = vector.broadcast %86 : vector<1x128xf32> to vector<64x128xf32>
    %88 = arith.mulf %85, %87 : vector<64x128xf32>
    %89 = arith.addf %81, %88 : vector<64x128xf32>
    %c55_i32 = arith.constant 55 : i32
    %90 = tpu.dynamic_rotate %25 by %c55_i32 dim 0 : vector<64x128xf32>, i32 -> vector<64x128xf32>
    %91 = vector.extract_strided_slice %27 {offsets = [0, 7], sizes = [64, 1], strides = [1, 1]} : vector<64x8xf32> to vector<64x1xf32>
    %92 = vector.broadcast %91 : vector<64x1xf32> to vector<64x128xf32>
    %93 = arith.mulf %90, %92 : vector<64x128xf32>
    %94 = vector.extract_strided_slice %26 {offsets = [8, 0], sizes = [1, 128], strides = [1, 1]} : vector<9x128xf32> to vector<1x128xf32>
    %95 = vector.broadcast %94 : vector<1x128xf32> to vector<64x128xf32>
    %96 = arith.mulf %93, %95 : vector<64x128xf32>
    %97 = arith.addf %89, %96 : vector<64x128xf32>
    %98 = arith.mulf %97, %97 : vector<64x128xf32>
    %99 = arith.mulf %98, %97 : vector<64x128xf32>
    %cst_19 = arith.constant 5.000000e-01 : f32
    %100 = vector.broadcast %cst_19 : f32 to vector<64x128xf32>
    %101 = arith.mulf %100, %97 : vector<64x128xf32>
    %cst_20 = arith.constant 4.471500e-02 : f32
    %102 = vector.broadcast %cst_20 : f32 to vector<64x128xf32>
    %103 = arith.mulf %102, %99 : vector<64x128xf32>
    %104 = arith.addf %97, %103 : vector<64x128xf32>
    %cst_21 = arith.constant 0.797884583 : f32
    %105 = vector.broadcast %cst_21 : f32 to vector<64x128xf32>
    %106 = arith.mulf %105, %104 : vector<64x128xf32>
    %107 = math.tanh %106 : vector<64x128xf32>
    %cst_22 = arith.constant 1.000000e+00 : f32
    %108 = vector.broadcast %cst_22 : f32 to vector<64x128xf32>
    %109 = arith.addf %108, %107 : vector<64x128xf32>
    %110 = arith.mulf %101, %109 : vector<64x128xf32>
    %111 = arith.truncf %110 : vector<64x128xf32> to vector<64x128xbf16>
    %c0_23 = arith.constant 0 : index
    %c0_24 = arith.constant 0 : index
    %112 = vector.load %arg9[%c0_23, %c0_24] : memref<128x16xbf16, #tpu.memory_space<vmem>>, vector<128x16xbf16>
    %cst_25 = arith.constant dense<0.000000e+00> : vector<64x16xf32>
    %113 = tpu.matmul %111, %112, %cst_25 {dimension_numbers = #tpu.dot_dimension_numbers<[1], [0], [0], [1], [0, 0, 1, 1], [], []>} : vector<64x128xbf16>, vector<128x16xbf16>, vector<64x16xf32> -> vector<64x16xf32>
    %c0_26 = arith.constant 0 : index
    %c0_27 = arith.constant 0 : index
    %114 = vector.load %arg10[%c0_26, %c0_27] : memref<1x16xf32, #tpu.memory_space<vmem>>, vector<1x16xf32>
    %115 = vector.broadcast %114 : vector<1x16xf32> to vector<64x16xf32>
    %116 = arith.addf %113, %115 : vector<64x16xf32>
    %c0_28 = arith.constant 0 : index
    %c0_29 = arith.constant 0 : index
    %117 = vector.load %arg11[%c0_28, %c0_29] : memref<64x16xf32, #tpu.memory_space<vmem>>, vector<64x16xf32>
    tpu.vector_store %arg11[%c0_28, %c0_29], %116 {strides = array<i32>} : memref<64x16xf32, #tpu.memory_space<vmem>>, vector<64x16xf32>,
    return
  }
  func.func @transform_0(%arg0: i32) -> (i32, i32) {
    %c0_i32 = arith.constant 0 : i32
    %c0_i32_0 = arith.constant 0 : i32
    return %arg0, %c0_i32 : i32, i32
  }
  func.func @transform_1(%arg0: i32) -> (i32, i32) {
    %c0_i32 = arith.constant 0 : i32
    %c0_i32_0 = arith.constant 0 : i32
    %c0_i32_1 = arith.constant 0 : i32
    return %c0_i32, %c0_i32_0 : i32, i32
  }
  func.func @transform_2(%arg0: i32) -> (i32, i32) {
    %c0_i32 = arith.constant 0 : i32
    %c0_i32_0 = arith.constant 0 : i32
    %c0_i32_1 = arith.constant 0 : i32
    return %c0_i32, %c0_i32_0 : i32, i32
  }
  func.func @transform_3(%arg0: i32) -> (i32, i32) {
    %c0_i32 = arith.constant 0 : i32
    %c0_i32_0 = arith.constant 0 : i32
    %c0_i32_1 = arith.constant 0 : i32
    return %c0_i32, %c0_i32_0 : i32, i32
  }
  func.func @transform_4(%arg0: i32) -> (i32, i32) {
    %c0_i32 = arith.constant 0 : i32
    %c0_i32_0 = arith.constant 0 : i32
    %c0_i32_1 = arith.constant 0 : i32
    return %c0_i32, %c0_i32_0 : i32, i32
  }
  func.func @transform_5(%arg0: i32) -> (i32, i32) {
    %c0_i32 = arith.constant 0 : i32
    %c0_i32_0 = arith.constant 0 : i32
    %c0_i32_1 = arith.constant 0 : i32
    return %c0_i32, %c0_i32_0 : i32, i32
  }
  func.func @transform_6(%arg0: i32) -> (i32, i32) {
    %c0_i32 = arith.constant 0 : i32
    %c0_i32_0 = arith.constant 0 : i32
    %c0_i32_1 = arith.constant 0 : i32
    return %c0_i32, %c0_i32_0 : i32, i32
  }
  func.func @transform_7(%arg0: i32) -> (i32, i32) {
    %c0_i32 = arith.constant 0 : i32
    %c0_i32_0 = arith.constant 0 : i32
    %c0_i32_1 = arith.constant 0 : i32
    return %c0_i32, %c0_i32_0 : i32, i32
  }
  func.func @transform_8(%arg0: i32) -> (i32, i32) {
    %c0_i32 = arith.constant 0 : i32
    %c0_i32_0 = arith.constant 0 : i32
    %c0_i32_1 = arith.constant 0 : i32
    return %c0_i32, %c0_i32_0 : i32, i32
  }
  func.func @transform_9(%arg0: i32) -> (i32, i32) {
    %c0_i32 = arith.constant 0 : i32
    %c0_i32_0 = arith.constant 0 : i32
    %c0_i32_1 = arith.constant 0 : i32
    return %c0_i32, %c0_i32_0 : i32, i32
  }
  func.func @transform_10(%arg0: i32) -> (i32, i32) {
    %c0_i32 = arith.constant 0 : i32
    %c0_i32_0 = arith.constant 0 : i32
    return %arg0, %c0_i32 : i32, i32
  }
}

</mosaic_0001>

<bundles_post_ra>
// kernel: tpu_custom_call.1
= control target key start
LH: loop header
LB: loop body
LE: loop exit
PB: predicated region body
PF: predicated region fallthrough
CT: control target
= control target key end

     0   :  { %s1649_s13 = smov 0   ;;  %s2437_s0 = inlined_call_operand.vmem [shape: f32[128,16], index: 0, kind: input, shape index: {}]   ;;  %s2438_s1 = inlined_call_operand.vmem [shape: f32[64,8], index: 1, kind: input, shape index: {}]   ;;  %s2439_s2 = inlined_call_operand.vmem [shape: bf16[16,128], index: 2, kind: input, shape index: {}]   ;;  %s2440_s3 = inlined_call_operand.vmem [shape: f32[1,128], index: 3, kind: input, shape index: {}]   ;;  %s2441_s4 = inlined_call_operand.vmem [shape: f32[1,128], index: 4, kind: input, shape index: {}]   ;;  %s2442_s5 = inlined_call_operand.vmem [shape: f32[1,128], index: 5, kind: input, shape index: {}]   ;;  %s2443_s6 = inlined_call_operand.vmem [shape: f32[9,128], index: 6, kind: input, shape index: {}]   ;;  %s2444_s7 = inlined_call_operand.vmem [shape: f32[1,128], index: 7, kind: input, shape index: {}]   ;;  %s2445_s8 = inlined_call_operand.vmem [shape: bf16[128,16], index: 8, kind: input, shape index: {}]   ;;  %s2446_s9 = inlined_call_operand.vmem [shape: f32[1,16], index: 9, kind: input, shape index: {}]   ;;  %s2447_s10 = inlined_call_operand.vmem [shape: f32[128,16], index: 10, kind: output, shape index: {}]  }
   0x1 LB: > { %s1408_s14 = sadd.s32 4294967295, %s1584_s13   ;;  %p1412_p0 = scmp.ge.s32.totalorder %s1584_s13, 1  ;;  %s1584_s13 = sphi %s1649_s13, %s20_s13  }
   0x2   : > { %p313_p1 = scmp.lt.s32.totalorder %s1584_s13, 3 }
   0x4   : > { %p314_p2 = pnand %p1412_p0, %p313_p1 }
   0x6   : > { %317 = sbr.rel (%p314_p2) target bundleno = 557 (0x22d), region = 60 }
   0xb   : > { %v1660_v0 = vld [vmem:[%s2438_s1 + $0x20] sm:$0xff]  ;;  %s1413_s19 = sshll.u32 %s1408_s14, 3  ;;  %v1586_v2 = vmov 0   ;;  %v1675_v4 = vld [vmem:[%s2438_s1 + $0x28] sm:$0xff]  ;;  %v1687_v6 = vld [vmem:[%s2438_s1 + $0x18] sm:$0xff]  ;;  %vm391_vm0 = vcmask 130048  }
   0xc   : > { %v1665_v1 = vld [vmem:[%s2438_s1] sm:$0xff]  ;;  %1522 = vset.pattern.permute.xlu1 %v1586_v2  ;;  %1521 = vset.pattern.permute.xlu0 %v1586_v2  ;;  %p352_p3 = scmp.lt.s32.totalorder %s1413_s19, 15  ;;  %v1680_v5 = vld [vmem:[%s2438_s1 + $0x8] sm:$0xff]  ;;  %v1700_v7 = vld [vmem:[%s2438_s1 + $0x10] sm:$0xff]  ;;  %v1587_v22 = vmov 1   ;;  %v1588_v23 = vmov 2  }
   0xd   : > { %v1537_v3 = vld [vmem:[%s2439_s2] sm:$0xff]   ;;  %649 = vperm.xlu1 %1522, %v1660_v0   ;;  %629 = vperm.xlu0 %1521, %v1665_v1   ;;  %v1705_v16 = vld [vmem:[%s2438_s1 + $0x38] sm:$0xff]  ;;  %v1712_v18 = vld [vmem:[%s2438_s1 + $0x30] sm:$0xff]  ;;  %v1589_v24 = vmov 3   ;;  %v1590_v25 = vmov 4   ;;  %v1591_v26 = vmov 5  }
   0xe   : > { %1455 = vmatprep.subr.bf16.mxu0 %v1537_v3  ;;  %s2540_s19 = smov (!%p352_p3, %s1413_s19), 15  ;;  %v1592_v27 = vmov 6   ;;  %v1593_v28 = vmov 7   ;;  %v1538_v56 = vld [vmem:[%s2445_s8 + $0x38] sm:$0xff]   ;;  %v1539_v57 = vld [vmem:[%s2445_s8 + $0x30] sm:$0xff]   ;;  %v1540_v60 = vld [vmem:[%s2445_s8 + $0x28] sm:$0xff]  }
   0xf   : > { %1456 = vmatpush3.bf16.msra.mxu0 %v1537_v3  ;;  %s1414_s28 = sshll.u32 %s2540_s19, 3  ;;  %1489 = vmatprep.subr.bf16.mxu1 %v1538_v56  ;;  %v1541_v63 = vld [vmem:[%s2445_s8 + $0x20] sm:$0xff]  }
  0x10   : > { %s355_s11 = scalar_lea.vmem %s2437_s0, %s1414_s28  ;;  %1465 = vmatprep.subr.bf16.mxu0 %v1538_v56  ;;  %1497 = vmatpush3.bf16.msra.mxu1 %v1538_v56  ;;  %s361_s17 = scalar_lea.vmem %s2447_s10, %s1414_s28 }
  0x11   : > { %654 = vperm.xlu1 %1522, %v1675_v4   ;;  %634 = vperm.xlu0 %1521, %v1680_v5   ;;  %v364_v8 = vld [vmem:[%s355_s11] sm:$0xff]  ;;  %v365_v9 = vld [vmem:[%s355_s11 + $0x8] sm:$0xff]  ;;  %v366_v10 = vld [vmem:[%s355_s11 + $0x10] sm:$0xff] }
  0x12   : > { %v372_v11 = vpack.c.bf16 %v365_v9, %v364_v8  ;;  %v367_v12 = vld [vmem:[%s355_s11 + $0x18] sm:$0xff]  ;;  %v368_v13 = vld [vmem:[%s355_s11 + $0x20] sm:$0xff]  ;;  %v369_v14 = vld [vmem:[%s355_s11 + $0x28] sm:$0xff]  ;;  %1490 = vmatprep.subr.bf16.mxu1 %v1539_v57 }
  0x13   : > { %v373_v15 = vpack.c.bf16 %v367_v12, %v366_v10  ;;  %v374_v17 = vpack.c.bf16 %v369_v14, %v368_v13  ;;  %v370_v19 = vld [vmem:[%s355_s11 + $0x30] sm:$0xff]  ;;  %v371_v20 = vld [vmem:[%s355_s11 + $0x38] sm:$0xff]  ;;  %v1544_v9 = vld [vmem:[%s2445_s8 + $0x8] sm:$0xff]  }
  0x14   : > { %1457 = vmatprep.mubr.msk.bf16.mxu0 %vm391_vm0, %v372_v11  ;;  %v375_v21 = vpack.c.bf16 %v371_v20, %v370_v19  ;;  %1498 = vmatpush3.bf16.msra.mxu1 %v1539_v57 }
  0x15   : > { %644 = vperm.xlu1 %1522, %v1687_v6   ;;  %1458 = vmatmul.mubr.msk.bf16.vlgmr.msra.gmra.mxu0 %vm391_vm0, %v373_v15 }
  0x16   : > { %639 = vperm.xlu0 %1521, %v1700_v7   ;;  %1461 = vmatprep.mubr.msk.bf16.mxu0 %vm391_vm0, %v374_v17 }
  0x17   : > { %1466 = vmatpush3.bf16.msra.mxu0 %v1538_v56  ;;  %1491 = vmatprep.subr.bf16.mxu1 %v1540_v60 }
  0x18   : > { %1467 = vmatprep.subr.bf16.mxu0 %v1539_v57  ;;  %1499 = vmatpush3.bf16.msra.mxu1 %v1540_v60 }
  0x19   : > { %664 = vperm.xlu1 %1522, %v1705_v16   ;;  %1492 = vmatprep.subr.bf16.mxu1 %v1541_v63 }
  0x1a   : > { %659 = vperm.xlu0 %1521, %v1712_v18  }
  0x1b   : > { %1468 = vmatpush3.bf16.msra.mxu0 %v1539_v57 }
  0x1c   : > { %1469 = vmatprep.subr.bf16.mxu0 %v1540_v60  ;;  %1500 = vmatpush3.bf16.msra.mxu1 %v1541_v63 }
  0x1d   : > { %1524 = vset.pattern.permute.xlu1 %v1587_v22  ;;  %1462 = vmatmul.mubr.msk.bf16.gmra.mxu0 %vm391_vm0, %v375_v21 }
  0x1e   : > { %700 = vperm.xlu1 %1524, %v1680_v5   ;;  %1523 = vset.pattern.permute.xlu0 %v1587_v22 }
  0x1f   : > { %696 = vperm.xlu0 %1523, %v1665_v1   ;;  %1470 = vmatpush3.bf16.msra.mxu0 %v1540_v60 }
  0x20   : > { %1471 = vmatprep.subr.bf16.mxu0 %v1541_v63 }
  0x22   : > { %712 = vperm.xlu1 %1524, %v1660_v0  }
  0x23   : > { %716 = vperm.xlu0 %1523, %v1675_v4   ;;  %1472 = vmatpush3.bf16.msra.mxu0 %v1541_v63 }
  0x26   : > { %704 = vperm.xlu1 %1524, %v1700_v7  }
  0x27   : > { %708 = vperm.xlu0 %1523, %v1687_v6  }
  0x2a   : > { %720 = vperm.xlu1 %1524, %v1712_v18  }
  0x2b   : > { %724 = vperm.xlu0 %1523, %v1705_v16  }
  0x2e   : > { %1525 = vset.pattern.permute.xlu1 %v1588_v23 }
  0x2f   : > { %773 = vperm.xlu1 %1525, %v1665_v1   ;;  %1526 = vset.pattern.permute.xlu0 %v1588_v23 }
  0x30   : > { %777 = vperm.xlu0 %1526, %v1680_v5  }
  0x33   : > { %789 = vperm.xlu1 %1525, %v1660_v0  }
  0x34   : > { %781 = vperm.xlu0 %1526, %v1700_v7  }
  0x37   : > { %793 = vperm.xlu1 %1525, %v1675_v4  }
  0x38   : > { %797 = vperm.xlu0 %1526, %v1712_v18  }
  0x3b   : > { %785 = vperm.xlu1 %1525, %v1687_v6  }
  0x3c   : > { %1527 = vset.pattern.permute.xlu0 %v1589_v24 }
  0x3d   : > { %833 = vperm.xlu0 %1527, %v1665_v1  }
  0x3f   : > { %801 = vperm.xlu1 %1525, %v1705_v16  }
  0x41   : > { %853 = vperm.xlu0 %1527, %v1675_v4  }
  0x43   : > { %1528 = vset.pattern.permute.xlu1 %v1589_v24 }
  0x44   : > { %837 = vperm.xlu1 %1528, %v1680_v5  }
  0x45   : > { %845 = vperm.xlu0 %1527, %v1687_v6  }
  0x48   : > { %849 = vperm.xlu1 %1528, %v1660_v0  }
  0x49   : > { %861 = vperm.xlu0 %1527, %v1705_v16  }
  0x4c   : > { %841 = vperm.xlu1 %1528, %v1700_v7  }
  0x4d   : > { %1530 = vset.pattern.permute.xlu0 %v1590_v25 }
  0x4e   : > { %897 = vperm.xlu0 %1530, %v1680_v5  }
  0x50   : > { %857 = vperm.xlu1 %1528, %v1712_v18  }
  0x52   : > { %901 = vperm.xlu0 %1530, %v1700_v7  }
  0x54   : > { %1529 = vset.pattern.permute.xlu1 %v1590_v25 }
  0x55   : > { %893 = vperm.xlu1 %1529, %v1665_v1  }
  0x56   : > { %917 = vperm.xlu0 %1530, %v1712_v18  }
  0x59   : > { %909 = vperm.xlu1 %1529, %v1660_v0  }
  0x5a   : > { %1531 = vset.pattern.permute.xlu0 %v1591_v26 }
  0x5b   : > { %953 = vperm.xlu0 %1531, %v1665_v1  }
  0x5d   : > { %913 = vperm.xlu1 %1529, %v1675_v4  }
  0x5f   : > { %973 = vperm.xlu0 %1531, %v1675_v4  }
  0x61   : > { %905 = vperm.xlu1 %1529, %v1687_v6  }
  0x63   : > { %965 = vperm.xlu0 %1531, %v1687_v6  }
  0x65   : > { %921 = vperm.xlu1 %1529, %v1705_v16  }
  0x67   : > { %981 = vperm.xlu0 %1531, %v1705_v16  }
  0x69   : > { %1532 = vset.pattern.permute.xlu1 %v1591_v26 }
  0x6a   : > { %957 = vperm.xlu1 %1532, %v1680_v5  }
  0x6b   : > { %1534 = vset.pattern.permute.xlu0 %v1592_v27 }
  0x6c   : > { %1017 = vperm.xlu0 %1534, %v1680_v5  }
  0x6e   : > { %969 = vperm.xlu1 %1532, %v1660_v0  }
  0x70   : > { %1021 = vperm.xlu0 %1534, %v1700_v7  }
  0x72   : > { %961 = vperm.xlu1 %1532, %v1700_v7  }
  0x74   : > { %1037 = vperm.xlu0 %1534, %v1712_v18  }
  0x76   : > { %977 = vperm.xlu1 %1532, %v1712_v18  }
  0x78   : > { %1535 = vset.pattern.permute.xlu0 %v1593_v28 }
  0x79   : > { %1073 = vperm.xlu0 %1535, %v1665_v1  }
  0x7a   : > { %1533 = vset.pattern.permute.xlu1 %v1592_v27 }
  0x7b   : > { %1013 = vperm.xlu1 %1533, %v1665_v1   ;;  %v1542_v1 = vld [vmem:[%s2445_s8 + $0x18] sm:$0xff]  }
  0x7c   : > { %1473 = vmatprep.subr.bf16.mxu0 %v1542_v1  ;;  %1493 = vmatprep.subr.bf16.mxu1 %v1542_v1 }
  0x7d   : > { %1093 = vperm.xlu0 %1535, %v1675_v4   ;;  %1474 = vmatpush3.bf16.msra.mxu0 %v1542_v1 }
  0x7e   : > { %1501 = vmatpush3.bf16.msra.mxu1 %v1542_v1 }
  0x7f   : > { %1029 = vperm.xlu1 %1533, %v1660_v0  }
  0x81   : > { %1085 = vperm.xlu0 %1535, %v1687_v6  }
  0x83   : > { %1033 = vperm.xlu1 %1533, %v1675_v4   ;;  %v1543_v4 = vld [vmem:[%s2445_s8 + $0x10] sm:$0xff]  }
  0x84   : > { %1475 = vmatprep.subr.bf16.mxu0 %v1543_v4  ;;  %1494 = vmatprep.subr.bf16.mxu1 %v1543_v4 }
  0x85   : > { %1101 = vperm.xlu0 %1535, %v1705_v16   ;;  %1476 = vmatpush3.bf16.msra.mxu0 %v1543_v4 }
  0x86   : > { %1502 = vmatpush3.bf16.msra.mxu1 %v1543_v4  ;;  %1477 = vmatprep.subr.bf16.mxu0 %v1544_v9 }
  0x87   : > { %1025 = vperm.xlu1 %1533, %v1687_v6   ;;  %v1417_v6 = vld [vmem:[%s2440_s3] ss:$0 sm:$0xff]  ;;  %1495 = vmatprep.subr.bf16.mxu1 %v1544_v9 }
  0x88   : > { %v1771_v29 = vpop.permute.xlu1 %649  ;;  %v1773_v30 = vpop.permute.xlu0 %629 }
  0x89   : > { %1478 = vmatpush3.bf16.msra.mxu0 %v1544_v9 }
  0x8a   : > { %1503 = vmatpush3.bf16.msra.mxu1 %v1544_v9 }
  0x8b   : > { %1041 = vperm.xlu1 %1533, %v1705_v16   ;;  %v1545_v16 = vld [vmem:[%s2445_s8] sm:$0xff]  }
  0x8c   : > { %v1776_v31 = vpop.permute.xlu1 %654  ;;  %v1778_v32 = vpop.permute.xlu0 %634  ;;  %1479 = vmatprep.subr.bf16.mxu0 %v1545_v16  ;;  %1496 = vmatprep.subr.bf16.mxu1 %v1545_v16 }
  0x8d   : > { %1480 = vmatpush3.bf16.msra.mxu0 %v1545_v16 }
  0x8e   : > { %1504 = vmatpush3.bf16.msra.mxu1 %v1545_v16 }
  0x8f   : > { %1536 = vset.pattern.permute.xlu1 %v1593_v28 }
  0x90   : > { %v1780_v33 = vpop.permute.xlu1 %644  ;;  %1077 = vperm.xlu1 %1536, %v1680_v5  }
  0x91   : > { %v1783_v34 = vpop.permute.xlu0 %639 }
  0x94   : > { %v1785_v35 = vpop.permute.xlu1 %664  ;;  %1089 = vperm.xlu1 %1536, %v1660_v0  }
  0x95   : > { %v1788_v36 = vpop.permute.xlu0 %659 }
  0x98   : > { %1081 = vperm.xlu1 %1536, %v1700_v7  }
  0x99   : > { %v1791_v37 = vpop.permute.xlu1 %700 }
  0x9a   : > { %2459 = vst [vmem:[#allocation2_spill] sm:$0xff] %v1791_v37  ;;  %v1793_v38 = vpop.permute.xlu0 %696 }
  0x9b   : > { %2460 = vst [vmem:[#allocation3_spill] sm:$0xff] %v1793_v38 }
  0x9c   : > { %1097 = vperm.xlu1 %1536, %v1712_v18  }
  0x9d   : > { %v1796_v39 = vpop.permute.xlu1 %712 }
  0x9e   : > { %2461 = vst [vmem:[#allocation4_spill] sm:$0xff] %v1796_v39  ;;  %v1798_v40 = vpop.permute.xlu0 %716 }
  0x9f   : > { %2462 = vst [vmem:[#allocation5_spill] sm:$0xff] %v1798_v40 }
  0xa1   : > { %v1800_v41 = vpop.permute.xlu1 %704 }
  0xa2   : > { %v1802_v42 = vpop.permute.xlu0 %708 }
  0xa3   : > { %2463 = vst [vmem:[#allocation6_spill] sm:$0xff] %v1802_v42 }
  0xa5   : > { %v1804_v43 = vpop.permute.xlu1 %720 }
  0xa6   : > { %2464 = vst [vmem:[#allocation7_spill] sm:$0xff] %v1804_v43  ;;  %v1806_v44 = vpop.permute.xlu0 %724 }
  0xa7   : > { %2465 = vst [vmem:[#allocation8_spill] sm:$0xff] %v1806_v44 }
  0xaa   : > { %v1808_v45 = vpop.permute.xlu1 %773 }
  0xab   : > { %2466 = vst [vmem:[#allocation9_spill] sm:$0xff] %v1808_v45  ;;  %v1810_v46 = vpop.permute.xlu0 %777 }
  0xac   : > { %2467 = vst [vmem:[#allocation10_spill] sm:$0xff] %v1810_v46 }
  0xae   : > { %v1812_v47 = vpop.permute.xlu1 %789 }
  0xaf   : > { %2468 = vst [vmem:[#allocation11_spill] sm:$0xff] %v1812_v47  ;;  %v1814_v48 = vpop.permute.xlu0 %781 }
  0xb2   : > { %v1816_v49 = vpop.permute.xlu1 %793 }
  0xb3   : > { %2469 = vst [vmem:[#allocation12_spill] sm:$0xff] %v1816_v49  ;;  %v1818_v50 = vpop.permute.xlu0 %797 }
  0xb4   : > { %2470 = vst [vmem:[#allocation13_spill] sm:$0xff] %v1818_v50 }
  0xb6   : > { %v1820_v51 = vpop.permute.xlu1 %785 }
  0xb7   : > { %2471 = vst [vmem:[#allocation14_spill] sm:$0xff] %v1820_v51 }
  0xb8   : > { %v1822_v52 = vpop.permute.xlu0 %833 }
  0xba   : > { %v1824_v53 = vpop.permute.xlu1 %801 }
  0xbb   : > { %2472 = vst [vmem:[#allocation15_spill] sm:$0xff] %v1824_v53 }
  0xbc   : > { %v1826_v54 = vpop.permute.xlu0 %853 }
  0xbf   : > { %v1828_v55 = vpop.permute.xlu1 %837 }
  0xc0   : > { %v1838_v59 = vpop.permute.xlu0 %845 }
  0xc3   : > { %v1836_v58 = vpop.permute.xlu1 %849 }
  0xc4   : > { %v1845_v62 = vpop.permute.xlu0 %861 }
  0xc7   : > { %v1843_v61 = vpop.permute.xlu1 %841 }
  0xc9   : > { %v1855_v2 = vpop.permute.xlu0 %897 }
  0xcb   : > { %v1850_v0 = vpop.permute.xlu1 %857 }
  0xcd   : > { %v1867_v7 = vpop.permute.xlu0 %901 }
  0xce   : > { %2475 = vst [vmem:[#allocation18_spill] sm:$0xff] %v1867_v7 }
  0xd0   : > { %v1857_v3 = vpop.permute.xlu1 %893 }
  0xd1   : > { %2473 = vst [vmem:[#allocation16_spill] sm:$0xff] %v1857_v3  ;;  %v1888_v20 = vpop.permute.xlu0 %917 }
  0xd2   : > { %2477 = vst [vmem:[#allocation20_spill] sm:$0xff] %v1888_v20 }
  0xd4   : > { %v1862_v5 = vpop.permute.xlu1 %909 }
  0xd5   : > { %2474 = vst [vmem:[#allocation17_spill] sm:$0xff] %v1862_v5  ;;  %v1459_v8 = vpop.f32.mrf.mxu0 }
  0xd6   : > { %v1872_v10 = vadd.f32 %v1459_v8, %v1417_v6 }
  0xd7   : > { %v438_v12 = vpop.f32.mrf.mxu0 }
  0xd8   : > { %v1874_v11 = vpop.permute.xlu1 %913  ;;  %v471_v13 = vmul.f32 %v1872_v10, %v1872_v10  ;;  %v1878_v14 = vadd.f32 %v1417_v6, %v438_v12 }
  0xd9   : > { %2476 = vst [vmem:[#allocation19_spill] sm:$0xff] %v1874_v11  ;;  %v1460_v15 = vpop.f32.mrf.mxu0 }
  0xda   : > { %v479_v17 = vmul.f32 %v471_v13, %v1872_v10  ;;  %v469_v18 = vmul.f32 %v1878_v14, %v1878_v14  ;;  %v1886_v19 = vadd.f32 %v1460_v15, %v1417_v6  ;;  %v1906_v13 = vpop.permute.xlu0 %953 }
  0xdb   : > { %v441_v21 = vpop.f32.mrf.mxu0 }
  0xdc   : > { %v495_v22 = vmul.f32 0.044715, %v479_v17  ;;  %v477_v23 = vmul.f32 %v469_v18, %v1878_v14  ;;  %v472_v24 = vmul.f32 %v1886_v19, %v1886_v19  ;;  %v1893_v25 = vpop.permute.xlu1 %905  ;;  %v1895_v26 = vadd.f32 %v1417_v6, %v441_v21 }
  0xdd   : > { %2478 = vst [vmem:[#allocation21_spill] sm:$0xff] %v1893_v25  ;;  %v1463_v27 = vpop.f32.mrf.mxu0 }
  0xde   : > { %v503_v28 = vadd.f32 %v495_v22, %v1872_v10  ;;  %v493_v56 = vmul.f32 0.044715, %v477_v23  ;;  %v480_v57 = vmul.f32 %v472_v24, %v1886_v19  ;;  %v1899_v60 = vadd.f32 %v1463_v27, %v1417_v6 }
  0xdf   : > { %v470_v63 = vmul.f32 %v1895_v26, %v1895_v26  ;;  %v454_v1 = vpop.f32.mrf.mxu0 }
  0xe0   : > { %v511_v4 = vmul.f32 0.7978846, %v503_v28  ;;  %v501_v8 = vadd.f32 %v493_v56, %v1878_v14  ;;  %v496_v9 = vmul.f32 0.044715, %v480_v57  ;;  %v475_v12 = vmul.f32 %v1899_v60, %v1899_v60  ;;  %v1913_v27 = vpop.permute.xlu1 %921 }
  0xe1   : > { %v478_v15 = vmul.f32 %v470_v63, %v1895_v26  ;;  %v1909_v17 = vadd.f32 %v1417_v6, %v454_v1  ;;  %v1464_v18 = vpop.f32.mrf.mxu0  ;;  %2479 = vst [vmem:[#allocation22_spill] sm:$0xff] %v1913_v27  ;;  %v1928_v27 = vpop.permute.xlu0 %973 }
  0xe2   : > { %1546 = vtanh.f32 %v511_v4  ;;  %v509_v21 = vmul.f32 0.7978846, %v501_v8  ;;  %v504_v22 = vadd.f32 %v496_v9, %v1886_v19  ;;  %v483_v23 = vmul.f32 %v475_v12, %v1899_v60 }
  0xe3   : > { %v494_v24 = vmul.f32 0.044715, %v478_v15  ;;  %v473_v28 = vmul.f32 %v1909_v17, %v1909_v17  ;;  %v1917_v16 = vadd.f32 %v1464_v18, %v1417_v6  ;;  %v457_v56 = vpop.f32.mrf.mxu0 }
  0xe4   : > { %1548 = vtanh.f32 %v509_v21  ;;  %v512_v57 = vmul.f32 0.7978846, %v504_v22  ;;  %v499_v63 = vmul.f32 0.044715, %v483_v23  ;;  %v1919_v1 = vadd.f32 %v1417_v6, %v457_v56 }
  0xe5   : > { %v502_v4 = vadd.f32 %v494_v24, %v1895_v26  ;;  %v481_v8 = vmul.f32 %v473_v28, %v1909_v17  ;;  %v476_v9 = vmul.f32 %v1917_v16, %v1917_v16  ;;  %v581_v22 = vlaneseq }
  0xe6   : > { %1550 = vtanh.f32 %v512_v57  ;;  %v507_v12 = vadd.f32 %v499_v63, %v1899_v60  ;;  %v474_v15 = vmul.f32 %v1919_v1, %v1919_v1  ;;  %v1933_v57 = vpop.permute.xlu1 %957 }
  0xe7   : > { %v510_v18 = vmul.f32 0.7978846, %v502_v4  ;;  %v497_v21 = vmul.f32 0.044715, %v481_v8  ;;  %v484_v6 = vmul.f32 %v476_v9, %v1917_v16  ;;  %v1935_v38 = vshrl.u32 %v581_v22, 7  ;;  %v1939_v9 = vpop.permute.xlu0 %965  ;;  %v571_v22 = vld [vmem:[%s2443_s6] sm:$0xff] }
  0xe8   : > { %v515_v23 = vmul.f32 0.7978846, %v507_v12  ;;  %v482_v24 = vmul.f32 %v474_v15, %v1919_v1 }
  0xe9   : > { %1552 = vtanh.f32 %v510_v18  ;;  %v505_v28 = vadd.f32 %v497_v21, %v1909_v17  ;;  %v500_v56 = vmul.f32 0.044715, %v484_v6  ;;  %v583_v21 = vsub.s32 4, %v1935_v38 }
  0xea   : > { %1554 = vtanh.f32 %v515_v23  ;;  %v498_v63 = vmul.f32 0.044715, %v482_v24  ;;  %v1942_v6 = vpop.permute.xlu1 %969  ;;  %v487_v23 = vmul.f32 0.5, %v1872_v10  ;;  %v485_v10 = vmul.f32 0.5, %v1878_v14 }
  0xeb   : > { %v513_v45 = vmul.f32 0.7978846, %v505_v28  ;;  %v508_v4 = vadd.f32 %v500_v56, %v1917_v16  ;;  %v677_v56 = vsub.s32 0, %v1935_v38  ;;  %v1963_v47 = vrot.slane %v571_v22, %v583_v21  ;;  %v1965_v39 = vpop.permute.xlu0 %981 }
  0xec   : > { %v506_v8 = vadd.f32 %v498_v63, %v1919_v1  ;;  %v874_v63 = vsub.s32 3, %v1935_v38  ;;  %v737_v11 = vsub.s32 1, %v1935_v38  ;;  %v814_v7 = vsub.s32 2, %v1935_v38 }
  0xed   : > { %1556 = vtanh.f32 %v513_v45  ;;  %v516_v12 = vmul.f32 0.7978846, %v508_v4  ;;  %v1951_v45 = vld [vmem:[%s2441_s4] ss:$0 sm:$0xff]  ;;  %v1054_v4 = vsub.s32 7, %v1935_v38  ;;  %vm618_vm1 = vcmp.lt.s32.totalorder %v1935_v38, 1 }
  0xee   : > { %v514_v15 = vmul.f32 0.7978846, %v506_v8  ;;  %v1972_v51 = vrot.slane %v571_v22, %v677_v56  ;;  %v1974_v50 = vrot.slane %v571_v22, %v874_v63  ;;  %v1978_v43 = vpop.permute.xlu1 %961  ;;  %v934_v42 = vsub.s32 5, %v1935_v38 }
  0xef   : > { %v1547_v18 = vpop.eup %1546  ;;  %1558 = vtanh.f32 %v516_v12  ;;  %v1976_v21 = vrot.slane %v571_v22, %v1054_v4  ;;  %v486_v56 = vmul.f32 0.5, %v1895_v26  ;;  %v1990_v4 = vrot.slane %v571_v22, %v814_v7 }
  0xf0   : > { %v527_v24 = vadd.f32 1.0, %v1547_v18  ;;  %1560 = vtanh.f32 %v514_v15  ;;  %v994_v18 = vsub.s32 6, %v1935_v38  ;;  %v1961_v15 = vld [vmem:[%s2442_s5] ss:$0 sm:$0xff]  ;;  %v1999_v26 = vrot.slane %v571_v22, %v934_v42 }
  0xf1   : > { %v1549_v28 = vpop.eup %1548  ;;  %2480 = vst [vmem:[#allocation23_spill] sm:$0xff] %v1976_v21  ;;  %2481 = vst [vmem:[#allocation24_spill] sm:$0xff] %v1990_v4  ;;  %v2012_v42 = vld [vmem:[%s2444_s7] ss:$0 sm:$0xff]  ;;  %vm763_vm2 = vcmp.lt.s32.totalorder %v1935_v38, 7 }
  0xf2   : > { %v535_v8 = vmul.f32 %v527_v24, %v487_v23  ;;  %v525_v12 = vadd.f32 1.0, %v1549_v28  ;;  %v488_v24 = vmul.f32 0.5, %v1886_v19  ;;  %2483 = vst [vmem:[#allocation26_spill] sm:$0xff] %v1999_v26 }
  0xf3   : > { %v1551_v25 = vpop.eup %1550 }
  0xf4   : > { %v550_v23 = vmul.f32 %v1951_v45, %v535_v8  ;;  %v533_v14 = vmul.f32 %v525_v12, %v485_v10  ;;  %v528_v28 = vadd.f32 1.0, %v1551_v25  ;;  %v1985_v25 = vrot.slane %v571_v22, %v994_v18 }
  0xf5   : > { %v1988_v12 = vrot.slane %v571_v22, %v737_v11  ;;  %v489_v18 = vmul.f32 0.5, %v1909_v17  ;;  %v490_v17 = vmul.f32 0.5, %v1919_v1 }
  0xf6   : > { %v1553_v3 = vpop.eup %1552  ;;  %v1982_v46 = vadd.f32 %v1961_v15, %v550_v23  ;;  %v548_v8 = vmul.f32 %v1951_v45, %v533_v14  ;;  %v536_v19 = vmul.f32 %v528_v28, %v488_v24  ;;  %v491_v23 = vmul.f32 0.5, %v1899_v60  ;;  %v1018_v28 = vpop.permute.xlu0 %1017 }
  0xf7   : > { %v1555_v10 = vpop.eup %1554  ;;  %v526_v63 = vadd.f32 1.0, %v1553_v3  ;;  %v492_v24 = vmul.f32 0.5, %v1917_v16 }
  0xf8   : > { %v1993_v37 = vadd.f32 %v1961_v15, %v548_v8  ;;  %v551_v5 = vmul.f32 %v1951_v45, %v536_v19  ;;  %v531_v49 = vadd.f32 1.0, %v1555_v10  ;;  %v1045_v8 = vmul.f32 %v1018_v28, %v1982_v46 }
  0xf9   : > { %v534_v14 = vmul.f32 %v526_v63, %v486_v56  ;;  %v587_v19 = vmul.f32 %v1963_v47, %v1982_v46  ;;  %v610_v16 = vrot.slane %v1982_v46, 7 }
  0xfa   : > { %2482 = vst [vmem:[#allocation25_spill] sm:$0xff] %v1993_v37  ;;  %v1557_v3 = vpop.eup %1556  ;;  %v2002_v7 = vadd.f32 %v1961_v15, %v551_v5  ;;  %v539_v11 = vmul.f32 %v531_v49, %v491_v23  ;;  %v2015_v5 = vpop.permute.xlu1 %977  ;;  %v608_v63 = vrot.slane %v1993_v37, 7  ;;  %v585_v20 = vmul.f32 %v1963_v47, %v1993_v37 }
  0xfb   : > { %v549_v60 = vmul.f32 %v1951_v45, %v534_v14  ;;  %v529_v10 = vadd.f32 1.0, %v1557_v3  ;;  %v2033_v40 = vadd.f32 %v2012_v42, %v587_v19 }
  0xfc   : > { %2484 = vst [vmem:[#allocation27_spill] sm:$0xff] %v2002_v7  ;;  %v1559_v49 = vpop.eup %1558  ;;  %v554_v22 = vmul.f32 %v1951_v45, %v539_v11  ;;  %v611_v56 = vrot.slane %v2002_v7, 7  ;;  %v2030_v11 = vmul.f32 %v1976_v21, %v1045_v8  ;;  %v2066_v37 = vadd.f32 %v2012_v42, %v585_v20 }
  0xfd   : > { %v1561_v14 = vpop.eup %1560  ;;  %v2022_v1 = vadd.f32 %v1961_v15, %v549_v60  ;;  %v537_v28 = vmul.f32 %v529_v10, %v489_v18  ;;  %v532_v3 = vadd.f32 1.0, %v1559_v49  ;;  %v588_v18 = vmul.f32 %v1963_v47, %v2002_v7  ;;  %v1022_v10 = vpop.permute.xlu0 %1021 }
  0xfe   : > { %v2027_v53 = vadd.f32 %v1961_v15, %v554_v22  ;;  %v530_v26 = vadd.f32 1.0, %v1561_v14  ;;  %2485 = vst [vmem:[#allocation28_spill] sm:$0xff] %v2030_v11  ;;  %v623_v8 = vsel %vm618_vm1, %v610_v16, %v611_v56  ;;  %v2044_v14 = vmul.f32 %v1022_v10, %v2002_v7 }
  0xff   : > { %v552_v23 = vmul.f32 %v1951_v45, %v537_v28  ;;  %v540_v4 = vmul.f32 %v532_v3, %v492_v24  ;;  %v609_v60 = vrot.slane %v2022_v1, 7  ;;  %v586_v22 = vmul.f32 %v1963_v47, %v2022_v1 }
 0x100   : > { %v538_v49 = vmul.f32 %v530_v26, %v490_v17  ;;  %v591_v26 = vmul.f32 %v1963_v47, %v2027_v53  ;;  %v2054_v17 = vpop.permute.xlu1 %1013 }
 0x101   : > { %v2047_v19 = vadd.f32 %v1961_v15, %v552_v23  ;;  %v555_v24 = vmul.f32 %v1951_v45, %v540_v4  ;;  %v624_v28 = vsel %vm618_vm1, %v609_v60, %v610_v16  ;;  %v603_v16 = vadd.f32 %v2012_v42, %v588_v18 }
 0x102   : > { %v553_v3 = vmul.f32 %v1951_v45, %v538_v49  ;;  %v670_v11 = vmul.f32 %v1780_v33, %v624_v28  ;;  %v866_v10 = vmul.f32 %v1843_v61, %v624_v28  ;;  %v985_v7 = vmul.f32 %v1933_v57, %v624_v28 }
 0x103   : > { %v612_v23 = vrot.slane %v2047_v19, 7  ;;  %v2062_v4 = vadd.f32 %v1961_v15, %v555_v24  ;;  %v601_v45 = vadd.f32 %v2012_v42, %v586_v22  ;;  %v671_v33 = vmul.f32 %v1771_v29, %v623_v8 }
 0x104   : > { %v2069_v44 = vadd.f32 %v1961_v15, %v553_v3  ;;  %v867_v61 = vmul.f32 %v1838_v59, %v623_v8  ;;  %v625_v18 = vsel %vm618_vm1, %v608_v63, %v609_v60  ;;  %v606_v20 = vadd.f32 %v2012_v42, %v591_v26  ;;  %v2094_v26 = vpop.permute.xlu1 %1029 }
 0x105   : > { %v622_v57 = vsel %vm618_vm1, %v611_v56, %v612_v23  ;;  %v615_v49 = vrot.slane %v2062_v4, 7  ;;  %v682_v15 = vmul.f32 %v1972_v51, %v670_v11  ;;  %v2083_v22 = vmul.f32 %v1974_v50, %v866_v10  ;;  %v1038_v10 = vpop.permute.xlu0 %1037 }
 0x106   : > { %v672_v24 = vmul.f32 %v1776_v31, %v622_v57  ;;  %v2086_v29 = vmul.f32 %v1985_v25, %v985_v7  ;;  %v868_v59 = vmul.f32 %v1836_v58, %v622_v57  ;;  %v613_v28 = vrot.slane %v2069_v44, 7 }
 0x107   : > { %2486 = vst [vmem:[#allocation29_spill] sm:$0xff] %v2083_v22  ;;  %v626_v56 = vsel %vm618_vm1, %v615_v49, %v608_v63  ;;  %v589_v60 = vmul.f32 %v1963_v47, %v2047_v19  ;;  %v987_v31 = vmul.f32 %v1939_v9, %v622_v57  ;;  %v669_v3 = vmul.f32 %v1783_v34, %v625_v18 }
 0x108   : > { %2487 = vst [vmem:[#allocation30_spill] sm:$0xff] %v2086_v29  ;;  %v668_v11 = vmul.f32 %v1778_v32, %v626_v56  ;;  %v984_v7 = vmul.f32 %v1906_v13, %v625_v18  ;;  %v864_v58 = vmul.f32 %v1822_v52, %v626_v56  ;;  %v2102_v63 = vmul.f32 %v1828_v55, %v625_v18 }
 0x109   : > { %v991_v29 = vmul.f32 %v1965_v39, %v626_v56  ;;  %v621_v22 = vsel %vm618_vm1, %v612_v23, %v613_v28  ;;  %v2113_v52 = vmul.f32 %v1972_v51, %v672_v24  ;;  %v2116_v55 = vmul.f32 %v1974_v50, %v868_v59 }
 0x10a   : > { %v680_v9 = vmul.f32 %v1972_v51, %v668_v11  ;;  %v673_v32 = vmul.f32 %v1788_v36, %v621_v22  ;;  %v869_v34 = vmul.f32 %v1826_v54, %v621_v22  ;;  %v988_v13 = vmul.f32 %v1942_v6, %v621_v22  ;;  %v1034_v22 = vpop.permute.xlu1 %1033 }
 0x10b   : > { %v2118_v39 = vadd.f32 %v682_v15, %v603_v16  ;;  %v604_v23 = vadd.f32 %v2012_v42, %v589_v60  ;;  %v2122_v57 = vmul.f32 %v1985_v25, %v987_v31  ;;  %v2125_v18 = vmul.f32 %v1974_v50, %v864_v58  ;;  %v1074_v31 = vpop.permute.xlu0 %1073 }
 0x10c   : > { %v2128_v36 = vmul.f32 %v1985_v25, %v984_v7  ;;  %v2131_v54 = vmul.f32 %v1985_v25, %v991_v29  ;;  %v2133_v6 = vadd.f32 %v680_v9, %v601_v45  ;;  %v685_v24 = vmul.f32 %v1972_v51, %v673_v32 }
 0x10d   : > { %v2137_v16 = vmul.f32 %v1974_v50, %v869_v34  ;;  %v683_v15 = vmul.f32 %v1972_v51, %v671_v33  ;;  %v2141_v59 = vmul.f32 %v1985_v25, %v988_v13  ;;  %v986_v56 = vmul.f32 %v1978_v43, %v623_v8 }
 0x10e   : > { %2488 = vst [vmem:[#allocation31_spill] sm:$0xff] %v2128_v36  ;;  %2489 = vst [vmem:[#allocation32_spill] sm:$0xff] %v2131_v54  ;;  %v614_v60 = vrot.slane %v2027_v53, 7  ;;  %v681_v29 = vmul.f32 %v1972_v51, %v669_v3  ;;  %v2149_v11 = vmul.f32 %v1974_v50, %v867_v61  ;;  %v729_v7 = vmul.f32 %v1800_v41, %v2022_v1 }
 0x10f   : > { %v2146_v45 = vadd.f32 %v683_v15, %v604_v23  ;;  %v2454_v33 = vrot.slane %v2022_v1, 1  ;;  %v2156_v58 = vmul.f32 %v1976_v21, %v2044_v14  ;;  %v1050_v3 = vmul.f32 %v1038_v10, %v2062_v4  ;;  %v1094_v15 = vpop.permute.xlu0 %1093 }
 0x110   : > { %v619_v43 = vsel %vm618_vm1, %v614_v60, %v615_v49  ;;  %v620_v8 = vsel %vm618_vm1, %v613_v28, %v614_v60  ;;  %v2163_v9 = vadd.f32 %v685_v24, %v606_v20  ;;  %v689_v32 = vadd.f32 %v681_v29, %v2033_v40 }
 0x111   : > { %v667_v61 = vmul.f32 %v1773_v30, %v619_v43  ;;  %v871_v41 = vmul.f32 %v1845_v62, %v619_v43  ;;  %v2169_v34 = vmul.f32 %v1985_v25, %v986_v56  ;;  %v674_v14 = vmul.f32 %v1785_v35, %v620_v8  ;;  %v1026_v35 = vpop.permute.xlu1 %1025 }
 0x112   : > { %v990_v49 = vmul.f32 %v2015_v5, %v619_v43  ;;  %v2490_v13 = vrot.slane %v1982_v46, 1  ;;  %v741_v62 = vmul.f32 %v1988_v12, %v729_v7  ;;  %v2184_v28 = vmul.f32 %v2054_v17, %v2022_v1  ;;  %v2494_v7 = vld [vmem:[#allocation8_spill] sm:$0xff] }
 0x113   : > { %v679_v30 = vmul.f32 %v1972_v51, %v667_v61  ;;  %v2187_v5 = vmul.f32 %v1850_v0, %v620_v8  ;;  %v2190_v10 = vmul.f32 %v1974_v50, %v871_v41  ;;  %v2193_v23 = vmul.f32 %v1928_v27, %v620_v8  ;;  %v2495_v8 = vld [vmem:[#allocation24_spill] sm:$0xff] }
 0x114   : > { %v769_v20 = vsel %vm763_vm2, %v2454_v33, %v2490_v13  ;;  %2491 = vst [vmem:[#allocation33_spill] sm:$0xff] %v2184_v28  ;;  %v2196_v24 = vmul.f32 %v1976_v21, %v1050_v3  ;;  %v749_v56 = vadd.f32 %v741_v62, %v689_v32  ;;  %v592_v0 = vmul.f32 %v1963_v47, %v2062_v4  ;;  %v1086_v33 = vpop.permute.xlu0 %1085 }
 0x115   : > { %v806_v40 = vmul.f32 %v1814_v48, %v769_v20  ;;  %v2199_v48 = vmul.f32 %v1985_v25, %v990_v49  ;;  %v925_v17 = vmul.f32 %v1855_v2, %v769_v20  ;;  %v2205_v60 = vadd.f32 %v679_v30, %v2066_v37  ;;  %v1042_v62 = vpop.permute.xlu1 %1041 }
 0x116   : > { %2492 = vst [vmem:[#allocation34_spill] sm:$0xff] %v2196_v24  ;;  %v2207_v29 = vmul.f32 %v1074_v31, %v769_v20  ;;  %v686_v27 = vmul.f32 %v1972_v51, %v674_v14  ;;  %v734_v43 = vmul.f32 %v2494_v7, %v2027_v53  ;;  %v607_v61 = vadd.f32 %v2012_v42, %v592_v0  ;;  %v2496_v51 = vld [vmem:[#allocation5_spill] sm:$0xff]  ;;  %v2510_v24 = vld [vmem:[#allocation27_spill] sm:$0xff] }
 0x117   : > { %v818_v3 = vmul.f32 %v2495_v8, %v806_v40  ;;  %v761_v41 = vrot.slane %v2027_v53, 1  ;;  %v2455_v2 = vrot.slane %v2062_v4, 1  ;;  %v1048_v37 = vmul.f32 %v2094_v26, %v2069_v44  ;;  %v2497_v40 = vld [vmem:[#allocation26_spill] sm:$0xff]  ;;  %v2498_v26 = vld [vmem:[#allocation15_spill] sm:$0xff] }
 0x118   : > { %2493 = vst [vmem:[#allocation35_spill] sm:$0xff] %v2207_v29  ;;  %v746_v32 = vmul.f32 %v1988_v12, %v734_v43  ;;  %v590_v31 = vmul.f32 %v1963_v47, %v2069_v44  ;;  %v732_v14 = vmul.f32 %v2496_v51, %v2047_v19  ;;  %v694_v49 = vadd.f32 %v686_v27, %v607_v61  ;;  %v2499_v47 = vld [vmem:[#allocation20_spill] sm:$0xff] }
 0x119   : > { %v764_v13 = vsel %vm763_vm2, %v761_v41, %v2455_v2  ;;  %v2456_v20 = vrot.slane %v2047_v19, 1  ;;  %v760_v30 = vrot.slane %v2069_v44, 1  ;;  %v2230_v0 = vmul.f32 %v2497_v40, %v925_v17 }
 0x11a   : > { %v811_v7 = vmul.f32 %v2498_v26, %v764_v13  ;;  %v930_v43 = vmul.f32 %v2499_v47, %v764_v13  ;;  %v605_v27 = vadd.f32 %v2012_v42, %v590_v31  ;;  %v754_v61 = vadd.f32 %v746_v32, %v694_v49  ;;  %v2501_v42 = vld [vmem:[#allocation12_spill] sm:$0xff] }
 0x11b   : > { %v1109_v51 = vmul.f32 %v1094_v15, %v764_v13  ;;  %v766_v2 = vsel %vm763_vm2, %v2456_v20, %v760_v30  ;;  %v1049_v29 = vmul.f32 %v1034_v22, %v2027_v53  ;;  %v826_v36 = vadd.f32 %v818_v3, %v749_v56  ;;  %v2502_v15 = vld [vmem:[#allocation17_spill] sm:$0xff]  ;;  %v2251_v13 = vld [vmem:[%s2443_s6 + $0x8] ss:$0 sm:$0xff]  ;;  %v2507_v20 = vld [vmem:[#allocation16_spill] sm:$0xff] }
 0x11c   : > { %v2241_v17 = vmul.f32 %v1976_v21, %v1048_v37  ;;  %v692_v26 = vadd.f32 %v2113_v52, %v605_v27  ;;  %v744_v47 = vmul.f32 %v1988_v12, %v732_v14  ;;  %v823_v28 = vmul.f32 %v2495_v8, %v811_v7  ;;  %v2503_v56 = vld [vmem:[#allocation25_spill] sm:$0xff]  ;;  %v2504_v52 = vld [vmem:[#allocation2_spill] sm:$0xff]  ;;  %v1078_v27 = vpop.permute.xlu1 %1077 }
 0x11d   : > { %v809_v32 = vmul.f32 %v2501_v42, %v766_v2  ;;  %v928_v31 = vmul.f32 %v2502_v15, %v766_v2  ;;  %v1107_v49 = vmul.f32 %v1086_v33, %v766_v2  ;;  %v2254_v53 = vmul.f32 %v2497_v40, %v930_v43  ;;  %v1102_v42 = vpop.permute.xlu0 %1101 }
 0x11e   : > { %2500 = vst [vmem:[#allocation8_spill] sm:$0xff] %v2241_v17  ;;  %v752_v22 = vadd.f32 %v744_v47, %v692_v26  ;;  %v728_v3 = vmul.f32 %v2504_v52, %v2503_v56  ;;  %v2457_v37 = vrot.slane %v2503_v56, 1  ;;  %v2259_v14 = vadd.f32 %v823_v28, %v754_v61 }
 0x11f   : > { %v2262_v7 = vmul.f32 %v2251_v13, %v1109_v51  ;;  %v821_v33 = vmul.f32 %v2495_v8, %v809_v32  ;;  %v2266_v2 = vmul.f32 %v1976_v21, %v1049_v29  ;;  %v2505_v26 = vrot.slane %v2022_v1, 1  ;;  %v2506_v32 = vld [vmem:[#allocation10_spill] sm:$0xff] }
 0x120   : > { %v740_v43 = vmul.f32 %v1988_v12, %v728_v3  ;;  %v1047_v61 = vmul.f32 %v1026_v35, %v2047_v19  ;;  %v1051_v51 = vmul.f32 %v1042_v62, %v2503_v56  ;;  %v2278_v47 = vmul.f32 %v2497_v40, %v928_v31  ;;  %v2508_v35 = vld [vmem:[#allocation6_spill] sm:$0xff] }
 0x121   : > { %v770_v28 = vsel %vm763_vm2, %v2457_v37, %v2505_v26  ;;  %v2281_v29 = vmul.f32 %v2251_v13, %v1107_v49  ;;  %v877_v1 = vmul.f32 %v1974_v50, %v2102_v63  ;;  %v829_v52 = vadd.f32 %v821_v33, %v752_v22 }
 0x122   : > { %v805_v15 = vmul.f32 %v2506_v32, %v770_v28  ;;  %v748_v3 = vadd.f32 %v740_v43, %v2133_v6  ;;  %v924_v26 = vmul.f32 %v2507_v20, %v770_v28  ;;  %v730_v37 = vmul.f32 %v2508_v35, %v1982_v46  ;;  %v2512_v6 = vld [vmem:[#allocation7_spill] sm:$0xff]  ;;  %v2515_v35 = vld [vmem:[#allocation13_spill] sm:$0xff] }
 0x123   : > { %v2291_v31 = vmul.f32 %v1102_v42, %v770_v28  ;;  %v2294_v49 = vmul.f32 %v1976_v21, %v1047_v61  ;;  %v758_v32 = vrot.slane %v2510_v24, 1  ;;  %v2298_v17 = vmul.f32 %v1976_v21, %v1051_v51  ;;  %v2514_v28 = vld [vmem:[#allocation29_spill] sm:$0xff] }
 0x124   : > { %v817_v62 = vmul.f32 %v2495_v8, %v805_v15  ;;  %v742_v63 = vmul.f32 %v1988_v12, %v730_v37  ;;  %v733_v20 = vmul.f32 %v2512_v6, %v2069_v44  ;;  %v765_v22 = vsel %vm763_vm2, %v760_v30, %v761_v41  ;;  %v1090_v15 = vpop.permute.xlu1 %1089  ;;  %v2516_v37 = vld [vmem:[#allocation14_spill] sm:$0xff] }
 0x125   : > { %2509 = vst [vmem:[#allocation24_spill] sm:$0xff] %v2291_v31  ;;  %2511 = vst [vmem:[#allocation5_spill] sm:$0xff] %v2298_v17  ;;  %v2513_v42 = vrot.slane %v1982_v46, 1  ;;  %v886_v61 = vadd.f32 %v2514_v28, %v826_v36  ;;  %v810_v51 = vmul.f32 %v2515_v35, %v765_v22  ;;  %v2517_v31 = vld [vmem:[#allocation18_spill] sm:$0xff]  ;;  %v2315_v41 = vmul.f32 %v2497_v40, %v924_v26  ;;  %v2522_v35 = vld [vmem:[#allocation11_spill] sm:$0xff] }
 0x126   : > { %v825_v33 = vadd.f32 %v817_v62, %v748_v3  ;;  %v750_v21 = vadd.f32 %v742_v63, %v2118_v39  ;;  %v745_v46 = vmul.f32 %v1988_v12, %v733_v20  ;;  %v882_v30 = vmul.f32 %v1974_v50, %v2187_v5  ;;  %v2518_v62 = vld [vmem:[#allocation19_spill] sm:$0xff]  ;;  %v2519_v5 = vld [vmem:[#allocation4_spill] sm:$0xff] }
 0x127   : > { %v768_v43 = vsel %vm763_vm2, %v2513_v42, %v758_v32  ;;  %v889_v39 = vadd.f32 %v2137_v16, %v829_v52  ;;  %v929_v63 = vmul.f32 %v2518_v62, %v765_v22  ;;  %v822_v26 = vmul.f32 %v2495_v8, %v810_v51  ;;  %v2520_v42 = vld [vmem:[#allocation30_spill] sm:$0xff] }
 0x128   : > { %v807_v17 = vmul.f32 %v2516_v37, %v768_v43  ;;  %v926_v44 = vmul.f32 %v2517_v31, %v768_v43  ;;  %v1105_v6 = vmul.f32 %v1078_v27, %v768_v43  ;;  %v885_v54 = vadd.f32 %v877_v1, %v825_v33  ;;  %v2523_v37 = vld [vmem:[#allocation28_spill] sm:$0xff] }
 0x129   : > { %v753_v1 = vadd.f32 %v745_v46, %v2163_v9  ;;  %v941_v50 = vmul.f32 %v2497_v40, %v929_v63  ;;  %v1001_v52 = vmul.f32 %v1985_v25, %v2193_v23 }
 0x12a   : > { %v819_v36 = vmul.f32 %v2495_v8, %v807_v17  ;;  %v938_v3 = vmul.f32 %v2497_v40, %v926_v44  ;;  %v945_v31 = vadd.f32 %v2230_v0, %v885_v54  ;;  %v1117_v27 = vmul.f32 %v2251_v13, %v1105_v6  ;;  %v1082_v54 = vpop.permute.xlu1 %1081  ;;  %v2524_v6 = vld [vmem:[#allocation21_spill] sm:$0xff] }
 0x12b   : > { %v731_v17 = vmul.f32 %v2519_v5, %v2510_v24  ;;  %v830_v16 = vadd.f32 %v822_v26, %v753_v1  ;;  %v2521_v0 = vrot.slane %v2047_v19, 1  ;;  %v949_v28 = vadd.f32 %v941_v50, %v889_v39  ;;  %v2525_v39 = vld [vmem:[#allocation3_spill] sm:$0xff]  ;;  %v2529_v5 = vld [vmem:[#allocation22_spill] sm:$0xff] }
 0x12c   : > { %v827_v20 = vadd.f32 %v819_v36, %v750_v21  ;;  %v946_v33 = vadd.f32 %v938_v3, %v886_v61  ;;  %v1005_v43 = vadd.f32 %v2520_v42, %v945_v31  ;;  %v1108_v21 = vmul.f32 %v1090_v15, %v765_v22 }
 0x12d   : > { %v767_v9 = vsel %vm763_vm2, %v758_v32, %v2521_v0  ;;  %v743_v61 = vmul.f32 %v1988_v12, %v731_v17  ;;  %v890_v23 = vadd.f32 %v882_v30, %v830_v16  ;;  %v1009_v22 = vadd.f32 %v1001_v52, %v949_v28 }
 0x12e   : > { %v808_v51 = vmul.f32 %v2522_v35, %v767_v9  ;;  %v1065_v24 = vadd.f32 %v2523_v37, %v1005_v43  ;;  %v887_v44 = vadd.f32 %v2149_v11, %v827_v20  ;;  %v927_v46 = vmul.f32 %v2524_v6, %v767_v9  ;;  %v2528_v20 = vld [vmem:[#allocation9_spill] sm:$0xff]  ;;  %v1098_v42 = vpop.permute.xlu1 %1097  ;;  %v2533_v6 = vld [vmem:[#allocation24_spill] sm:$0xff] }
 0x12f   : > { %v1006_v25 = vadd.f32 %v2169_v34, %v946_v33  ;;  %v751_v19 = vadd.f32 %v743_v61, %v2146_v45  ;;  %v1106_v32 = vmul.f32 %v1082_v54, %v767_v9  ;;  %v727_v62 = vmul.f32 %v2525_v39, %v2062_v4  ;;  %v2530_v61 = vld [vmem:[#allocation32_spill] sm:$0xff] }
 0x130   : > { %v820_v36 = vmul.f32 %v2495_v8, %v808_v51  ;;  %v2346_v3 = vadd.f32 %v1117_v27, %v1065_v24  ;;  %v939_v15 = vmul.f32 %v2497_v40, %v927_v46  ;;  %v2526_v34 = vrot.slane %v2503_v56, 1  ;;  %v2534_v46 = vld [vmem:[#allocation5_spill] sm:$0xff] }
 0x131   : > { %v1066_v11 = vadd.f32 %v2156_v58, %v1006_v25  ;;  %v1118_v31 = vmul.f32 %v2251_v13, %v1106_v32  ;;  %v2527_v45 = vrot.slane %v2062_v4, 1  ;;  %v739_v26 = vmul.f32 %v1988_v12, %v727_v62  ;;  %v2538_v62 = vld [vmem:[#allocation35_spill] sm:$0xff] }
 0x132   : > { %v828_v63 = vadd.f32 %v820_v36, %v751_v19  ;;  %v1133_v27 = vmul.f32 %v2346_v3, %v2346_v3  ;;  %v947_v1 = vadd.f32 %v939_v15, %v887_v44  ;;  %v891_v56 = vadd.f32 %v2190_v10, %v2259_v14  ;;  %v2532_v44 = vld [vmem:[#allocation34_spill] sm:$0xff]  ;;  %v2535_v19 = vld [vmem:[#allocation33_spill] sm:$0xff]  ;;  %v2536_v36 = vld [vmem:[#allocation23_spill] sm:$0xff] }
 0x133   : > { %v771_v30 = vsel %vm763_vm2, %v2527_v45, %v2526_v34  ;;  %v2364_v58 = vadd.f32 %v1118_v31, %v1066_v11  ;;  %v1069_v38 = vadd.f32 %v2266_v2, %v1009_v22  ;;  %v747_v43 = vadd.f32 %v739_v26, %v2205_v60  ;;  %v2537_v22 = vld [vmem:[#allocation31_spill] sm:$0xff] }
 0x134   : > { %v804_v33 = vmul.f32 %v2528_v20, %v771_v30  ;;  %v888_v50 = vadd.f32 %v2116_v55, %v828_v63  ;;  %v931_v4 = vmul.f32 %v2529_v5, %v771_v30  ;;  %v1007_v17 = vadd.f32 %v2122_v57, %v947_v1 }
 0x135   : > { %v1120_v16 = vmul.f32 %v2251_v13, %v1108_v21  ;;  %v1134_v52 = vmul.f32 %v2364_v58, %v2364_v58  ;;  %v1141_v14 = vmul.f32 %v1133_v27, %v2346_v3  ;;  %v950_v57 = vadd.f32 %v2254_v53, %v890_v23 }
 0x136   : > { %v816_v12 = vmul.f32 %v2495_v8, %v804_v33  ;;  %v948_v55 = vadd.f32 %v2278_v47, %v888_v50  ;;  %v943_v10 = vmul.f32 %v2497_v40, %v931_v4  ;;  %v1067_v2 = vadd.f32 %v2294_v49, %v1007_v17 }
 0x137   : > { %v1142_v8 = vmul.f32 %v1134_v52, %v2364_v58  ;;  %v1110_v9 = vmul.f32 %v1098_v42, %v771_v30  ;;  %v1010_v40 = vadd.f32 %v2199_v48, %v950_v57  ;;  %v2389_v21 = vadd.f32 %v2262_v7, %v1069_v38 }
 0x138   : > { %v824_v54 = vadd.f32 %v816_v12, %v747_v43  ;;  %v1008_v60 = vadd.f32 %v2141_v59, %v948_v55  ;;  %v951_v0 = vadd.f32 %v943_v10, %v891_v56  ;;  %v2384_v47 = vadd.f32 %v2281_v29, %v1067_v2  ;;  %v2531_v59 = vld [vmem:[#allocation8_spill] sm:$0xff] }
 0x139   : > { %v1158_v49 = vmul.f32 0.044715, %v1142_v8  ;;  %v1122_v53 = vmul.f32 %v2251_v13, %v1110_v9  ;;  %v1157_v37 = vmul.f32 0.044715, %v1141_v14  ;;  %v1070_v29 = vadd.f32 %v2532_v44, %v1010_v40 }
 0x13a   : > { %v884_v28 = vadd.f32 %v2125_v18, %v824_v54  ;;  %v1011_v35 = vadd.f32 %v2530_v61, %v951_v0  ;;  %v1068_v51 = vadd.f32 %v2531_v59, %v1008_v60  ;;  %v1137_v18 = vmul.f32 %v2389_v21, %v2389_v21 }
 0x13b   : > { %v1123_v48 = vmul.f32 %v2251_v13, %v2533_v6  ;;  %v1135_v7 = vmul.f32 %v2384_v47, %v2384_v47  ;;  %v1056_v32 = vmul.f32 %v2536_v36, %v2535_v19  ;;  %v1116_v63 = vmul.f32 %v2251_v13, %v2538_v62 }
 0x13c   : > { %v944_v24 = vadd.f32 %v2315_v41, %v884_v28  ;;  %v1071_v25 = vadd.f32 %v2534_v46, %v1011_v35  ;;  %v1128_v23 = vadd.f32 %v1120_v16, %v1068_v51  ;;  %v1130_v41 = vadd.f32 %v1122_v53, %v1070_v29 }
 0x13d   : > { %v1145_v39 = vmul.f32 %v1137_v18, %v2389_v21  ;;  %v1166_v11 = vadd.f32 %v1158_v49, %v2364_v58  ;;  %v1165_v1 = vadd.f32 %v1157_v37, %v2346_v3  ;;  %v1143_v20 = vmul.f32 %v1135_v7, %v2384_v47 }
 0x13e   : > { %v1004_v15 = vadd.f32 %v2537_v22, %v944_v24  ;;  %v1131_v31 = vadd.f32 %v1123_v48, %v1071_v25  ;;  %v1136_v34 = vmul.f32 %v1128_v23, %v1128_v23  ;;  %v1138_v30 = vmul.f32 %v1130_v41, %v1130_v41 }
 0x13f   : > { %v1161_v27 = vmul.f32 0.044715, %v1145_v39  ;;  %v1174_v5 = vmul.f32 0.7978846, %v1166_v11  ;;  %v1159_v38 = vmul.f32 0.044715, %v1143_v20 }
 0x140   : > { %v1064_v45 = vadd.f32 %v1056_v32, %v1004_v15  ;;  %v1144_v26 = vmul.f32 %v1136_v34, %v1128_v23  ;;  %v1146_v33 = vmul.f32 %v1138_v30, %v1130_v41  ;;  %v1139_v13 = vmul.f32 %v1131_v31, %v1131_v31 }
 0x141   : > { %v1169_v50 = vadd.f32 %v1161_v27, %v2389_v21  ;;  %v1173_v12 = vmul.f32 0.7978846, %v1165_v1  ;;  %v1167_v55 = vadd.f32 %v1159_v38, %v2384_v47  ;;  %v1153_v59 = vmul.f32 0.5, %v2389_v21 }
 0x142   : > { %v1124_v56 = vadd.f32 %v1116_v63, %v1064_v45  ;;  %v1160_v4 = vmul.f32 0.044715, %v1144_v26  ;;  %v1162_v17 = vmul.f32 0.044715, %v1146_v33  ;;  %v1147_v52 = vmul.f32 %v1139_v13, %v1131_v31 }
 0x143   : > { %v1177_v42 = vmul.f32 0.7978846, %v1169_v50  ;;  %v1175_v54 = vmul.f32 0.7978846, %v1167_v55  ;;  %v1152_v24 = vmul.f32 0.5, %v1128_v23  ;;  %v1154_v46 = vmul.f32 0.5, %v1130_v41 }
 0x144   : > { %v1132_v43 = vmul.f32 %v1124_v56, %v1124_v56  ;;  %v1168_v16 = vadd.f32 %v1160_v4, %v1128_v23  ;;  %v1170_v14 = vadd.f32 %v1162_v17, %v1130_v41  ;;  %v1163_v57 = vmul.f32 0.044715, %v1147_v52 }
 0x145   : > { %1562 = vtanh.f32 %v1177_v42  ;;  %v1150_v36 = vmul.f32 0.5, %v2364_v58  ;;  %v1149_v32 = vmul.f32 0.5, %v2346_v3  ;;  %v1155_v22 = vmul.f32 0.5, %v1131_v31 }
 0x146   : > { %v1140_v10 = vmul.f32 %v1132_v43, %v1124_v56  ;;  %1564 = vtanh.f32 %v1174_v5  ;;  %v1176_v2 = vmul.f32 0.7978846, %v1168_v16  ;;  %v1178_v8 = vmul.f32 0.7978846, %v1170_v14 }
 0x147   : > { %1566 = vtanh.f32 %v1173_v12  ;;  %v1171_v0 = vadd.f32 %v1163_v57, %v1131_v31  ;;  %v1148_v23 = vmul.f32 0.5, %v1124_v56  ;;  %v1151_v45 = vmul.f32 0.5, %v2384_v47  ;;  %v1427_v31 = vld [vmem:[%s2446_s9] ss:$0 sm:$0xff] }
 0x148   : > { %v1156_v60 = vmul.f32 0.044715, %v1140_v10  ;;  %1568 = vtanh.f32 %v1176_v2 }
 0x149   : > { %1570 = vtanh.f32 %v1175_v54  ;;  %v1179_v28 = vmul.f32 0.7978846, %v1171_v0 }
 0x14a   : > { %v1164_v9 = vadd.f32 %v1156_v60, %v1124_v56  ;;  %1572 = vtanh.f32 %v1178_v8 }
 0x14b   : > { %1574 = vtanh.f32 %v1179_v28 }
 0x14c   : > { %v1172_v40 = vmul.f32 0.7978846, %v1164_v9 }
 0x14e   : > { %1576 = vtanh.f32 %v1172_v40 }
 0x152   : > { %v1563_v49 = vpop.eup %1562 }
 0x153   : > { %v1565_v61 = vpop.eup %1564  ;;  %v1193_v35 = vadd.f32 1.0, %v1563_v49 }
 0x154   : > { %v1567_v53 = vpop.eup %1566  ;;  %v1190_v7 = vadd.f32 1.0, %v1565_v61 }
 0x155   : > { %v1569_v51 = vpop.eup %1568  ;;  %v1201_v29 = vmul.f32 %v1193_v35, %v1153_v59  ;;  %v1189_v6 = vadd.f32 1.0, %v1567_v53 }
 0x156   : > { %v1571_v37 = vpop.eup %1570  ;;  %v1192_v44 = vadd.f32 1.0, %v1569_v51  ;;  %v1198_v41 = vmul.f32 %v1190_v7, %v1150_v36 }
 0x157   : > { %v1573_v18 = vpop.eup %1572  ;;  %v1191_v21 = vadd.f32 1.0, %v1571_v37  ;;  %v1197_v34 = vmul.f32 %v1189_v6, %v1149_v32 }
 0x158   : > { %v1200_v48 = vmul.f32 %v1192_v44, %v1152_v24  ;;  %v1194_v25 = vadd.f32 1.0, %v1573_v18  ;;  %v1575_v19 = vpop.eup %1574 }
 0x159   : > { %v1195_v62 = vadd.f32 1.0, %v1575_v19  ;;  %v1199_v1 = vmul.f32 %v1191_v21, %v1151_v45 }
 0x15a   : > { %v1206_v39 = vpack.c.bf16 %v1201_v29, %v1200_v48  ;;  %v1202_v63 = vmul.f32 %v1194_v25, %v1154_v46 }
 0x15b   : > { %v1577_v15 = vpop.eup %1576  ;;  %v1203_v30 = vmul.f32 %v1195_v62, %v1155_v22  ;;  %v1205_v3 = vpack.c.bf16 %v1199_v1, %v1198_v41 }
 0x15c   : > { %v1188_v11 = vadd.f32 1.0, %v1577_v15  ;;  %1485 = vmatprep.mubr.bf16.mxu1 %v1206_v39 }
 0x15d   : > { %v1207_v58 = vpack.c.bf16 %v1203_v30, %v1202_v63 }
 0x15e   : > { %v1196_v27 = vmul.f32 %v1188_v11, %v1148_v23 }
 0x15f   : > { %1486 = vmatmul.mubr.bf16.vlgmr.msra.gmra.mxu1 %v1207_v58 }
 0x160   : > { %v1204_v26 = vpack.c.bf16 %v1197_v34, %v1196_v27 }
 0x162   : > { %1481 = vmatprep.mubr.bf16.mxu0 %v1204_v26 }
 0x163   : > { %1482 = vmatmul.mubr.bf16.vlgmr.msra.gmra.mxu0 %v1205_v3 }
 0x21f   : > { %v1487_v47 = vpop.f32.mrf.mxu1 }
 0x220   : > { %v1338_v20 = vadd.f32 %v1487_v47, %v1427_v31 }
 0x221   : > { %v1329_v50 = vpop.f32.mrf.mxu1 }
 0x222   : > { %1350 = vst.msk [vmem:[%s361_s17 + $0x30] sm:$0xff] %vm391_vm0, %v1338_v20  ;;  %v1330_v5 = vadd.f32 %v1427_v31, %v1329_v50 }
 0x223   : > { %v1483_v33 = vpop.f32.mrf.mxu0  ;;  %v1488_v38 = vpop.f32.mrf.mxu1 }
 0x224   : > { %v1322_v56 = vadd.f32 %v1483_v33, %v1427_v31  ;;  %1348 = vst.msk [vmem:[%s361_s17 + $0x20] sm:$0xff] %vm391_vm0, %v1330_v5  ;;  %v1341_v17 = vadd.f32 %v1488_v38, %v1427_v31 }
 0x225   : > { %v1313_v4 = vpop.f32.mrf.mxu0  ;;  %v1332_v43 = vpop.f32.mrf.mxu1 }
 0x226   : > { %1346 = vst.msk [vmem:[%s361_s17 + $0x10] sm:$0xff] %vm391_vm0, %v1322_v56  ;;  %v1314_v13 = vadd.f32 %v1427_v31, %v1313_v4  ;;  %1351 = vst.msk [vmem:[%s361_s17 + $0x38] sm:$0xff] %vm391_vm0, %v1341_v17  ;;  %v1333_v16 = vadd.f32 %v1427_v31, %v1332_v43 }
 0x227   : > { %v1484_v42 = vpop.f32.mrf.mxu0 }
 0x228   : > { %1344 = vst.msk [vmem:[%s361_s17] sm:$0xff] %vm391_vm0, %v1314_v13  ;;  %v1325_v12 = vadd.f32 %v1484_v42, %v1427_v31  ;;  %1349 = vst.msk [vmem:[%s361_s17 + $0x28] sm:$0xff] %vm391_vm0, %v1333_v16 }
 0x229   : > { %v1316_v55 = vpop.f32.mrf.mxu0 }
 0x22a   : > { %1347 = vst.msk [vmem:[%s361_s17 + $0x18] sm:$0xff] %vm391_vm0, %v1325_v12  ;;  %v1317_v52 = vadd.f32 %v1427_v31, %v1316_v55 }
 0x22c   : > { %1345 = vst.msk [vmem:[%s361_s17 + $0x8] sm:$0xff] %vm391_vm0, %v1317_v52 }
 0x22d PF: > { %s20_s13 = sadd.s32 1, %s1584_s13  }
 0x22e   : > { %p17_p4 = scmp.ge.s32.totalorder %s20_s13, 4  }
 0x230   :  { %19 = sbr.rel (!%p17_p4) target bundleno = 1 (0x1), region = 90 }

</bundles_post_ra>
